<compile_context>
chip_gen: v7x
topology: tpu7x:2x2x1
jax: 0.10.0
libtpu: 0.0.40
codegen_flags: <defaults>
</compile_context>

<pallas_src>
import functools

import numpy as np

import jax
import jax.numpy as jnp
from jax.experimental import pallas as pl
from jax.experimental.pallas import tpu as pltpu


# ----------------------------------------------------------------------------
# In-kernel helpers (flipped layout: (channels, flattened padded spatial))
# ----------------------------------------------------------------------------
def _conv3x3(src_ref, patches_ref, w_ref, b_ref, wp):
    """3x3 conv (pad=1) + folded-BN bias + ReLU.

    src_ref:     (Cin, n_pos + 2*(wp+1)) bf16  zero-padded image in flat row-major
                 (i, j) order with (wp+1) zero extension columns on each side.
    patches_ref: (9*Cin, n_pos) bf16 VMEM scratch (im2col slab, built from 9 lane slices).
    w_ref:       (Cout, 9*Cin) bf16  taps folded into K, BN scale pre-folded.
    b_ref:       (Cout, 1) f32.
    Returns (Cout, n_pos) f32; entries at padded-border positions are garbage and are
    zeroed / ignored by the caller.
    """
    cin = src_ref.shape[0]
    n_pos = patches_ref.shape[1]
    for dy in range(3):
        for dx in range(3):
            t = dy * 3 + dx
            off = dy * wp + dx                      # tap (dy,dx) -> contiguous lane slice
            patches_ref[t * cin:(t + 1) * cin, :] = src_ref[:, off:off + n_pos]
    acc = jnp.dot(w_ref[...], patches_ref[...], preferred_element_type=jnp.float32)
    return jnp.maximum(acc + b_ref[...], 0.0)


def _pool_to_next(y, wp, t_ref):
    """Fused 2x2 maxpool + stride-2 subsample + re-pad for the next conv layer.

    y:     (Cout, n_pos) f32 conv output at all padded positions (interior valid).
    t_ref: (n_pos - wp - 1, L_next) bf16 0/1 selection matrix: picks the window-max at
           stride-2 positions and scatters it into the next layer's padded+extended
           flat buffer (all other columns come out exactly 0).
    """
    lm = t_ref.shape[0]
    m = jnp.maximum(jnp.maximum(y[:, 0:lm], y[:, 1:lm + 1]),
                    jnp.maximum(y[:, wp:wp + lm], y[:, wp + 1:wp + 1 + lm]))
    return jnp.dot(m.astype(jnp.bfloat16), t_ref[...],
                   preferred_element_type=jnp.float32)


def _convnet_kernel(x_ref, mask1_ref, w1_ref, b1_ref, w2_ref, b2_ref, t1_ref,
                    w3_ref, b3_ref, t2_ref, w4_ref, b4_ref, wh_ref, bh_ref,
                    o_ref,
                    p1_ref, p2_ref, p3_ref, p4_ref, buf2_ref, buf3_ref, buf4_ref,
                    *, wp1, wp2, wp3, hp3, ext1):
    # ---- conv1 + BN + ReLU -> conv2 input buffer (same spatial size) ----
    buf2_ref[...] = jnp.zeros_like(buf2_ref)       # extension/border columns must be 0
    y1 = _conv3x3(x_ref, p1_ref, w1_ref, b1_ref, wp1)            # (C1, hp1*wp1) f32
    y1 = y1 * mask1_ref[...]                                     # zero border garbage
    n1 = p1_ref.shape[1]
    buf2_ref[:, ext1:ext1 + n1] = y1.astype(jnp.bfloat16)

    # ---- conv2 + BN + ReLU, fused 2x2 maxpool -> conv3 padded input ----
    y2 = _conv3x3(buf2_ref, p2_ref, w2_ref, b2_ref, wp1)
    buf3_ref[...] = _pool_to_next(y2, wp1, t1_ref).astype(jnp.bfloat16)

    # ---- conv3 + BN + ReLU, fused 2x2 maxpool -> conv4 padded input ----
    y3 = _conv3x3(buf3_ref, p3_ref, w3_ref, b3_ref, wp2)
    buf4_ref[...] = _pool_to_next(y3, wp2, t2_ref).astype(jnp.bfloat16)

    # ---- conv4 + BN + ReLU, 2x2 maxpool, global avg (1/P folded into wh),
    #      Dropout(eval)=identity, Linear ----
    y4 = _conv3x3(buf4_ref, p4_ref, w4_ref, b4_ref, wp3)         # (C4, hp3*wp3) f32
    n4 = hp3 * wp3
    lm = n4 - wp3 - 1
    m4 = jnp.maximum(jnp.maximum(y4[:, 0:lm], y4[:, 1:lm + 1]),
                     jnp.maximum(y4[:, wp3:wp3 + lm], y4[:, wp3 + 1:wp3 + 1 + lm]))
    feat = None
    for pi in range((hp3 - 2) // 2):
        for pj in range((wp3 - 2) // 2):
            q = (2 * pi + 1) * wp3 + (2 * pj + 1)
            s = m4[:, q:q + 1]
            feat = s if feat is None else feat + s               # (C4, 1) f32
    # Linear head: sum over channels (sublanes) of w_head * feat  -> (1, n_classes)
    logits = jnp.sum(wh_ref[...] * feat, axis=0, keepdims=True) + bh_ref[...]
    o_ref[...] = logits


# ----------------------------------------------------------------------------
# pallas_call wrapper (single launch for the whole forward pass)
# ----------------------------------------------------------------------------
@jax.jit
def simple_convnet_forward(x_nchw, conv_prepped, w_head, b_head, mask1, t1, t2):
    (w1, b1), (w2, b2), (w3, b3), (w4, b4) = conv_prepped
    B, c0, H, W = x_nchw.shape
    hp1, wp1 = H + 2, W + 2
    e1 = wp1 + 1
    n1, l1 = hp1 * wp1, hp1 * wp1 + 2 * e1
    hp2, wp2 = H // 2 + 2, W // 2 + 2
    e2 = wp2 + 1
    n2, l2 = hp2 * wp2, hp2 * wp2 + 2 * e2
    hp3, wp3 = H // 4 + 2, W // 4 + 2
    e3 = wp3 + 1
    n3, l3 = hp3 * wp3, hp3 * wp3 + 2 * e3
    c1, c2, c3, c4 = w1.shape[0], w2.shape[0], w3.shape[0], w4.shape[0]
    ncls = w_head.shape[1]

    # Entry-point layout prep (done once, in bf16): NCHW is already channels-major, so
    # just zero-pad spatial, flatten (i, j), and add the +-(wp+1) zero extension columns.
    x = x_nchw.astype(jnp.bfloat16)
    x = jnp.pad(x, ((0, 0), (0, 0), (1, 1), (1, 1))).reshape(B, c0, n1)
    x = jnp.pad(x, ((0, 0), (0, 0), (e1, e1)))                    # (B, c0, l1)

    kernel = functools.partial(_convnet_kernel, wp1=wp1, wp2=wp2, wp3=wp3,
                               hp3=hp3, ext1=e1)
    out = pl.pallas_call(
        kernel,
        out_shape=jax.ShapeDtypeStruct((B, 1, ncls), jnp.float32),
        grid=(B,),
        in_specs=[
            pl.BlockSpec((None, c0, l1), lambda b: (b, 0, 0)),
            pl.BlockSpec(mask1.shape, lambda b: (0, 0)),
            pl.BlockSpec(w1.shape, lambda b: (0, 0)),
            pl.BlockSpec(b1.shape, lambda b: (0, 0)),
            pl.BlockSpec(w2.shape, lambda b: (0, 0)),
            pl.BlockSpec(b2.shape, lambda b: (0, 0)),
            pl.BlockSpec(t1.shape, lambda b: (0, 0)),
            pl.BlockSpec(w3.shape, lambda b: (0, 0)),
            pl.BlockSpec(b3.shape, lambda b: (0, 0)),
            pl.BlockSpec(t2.shape, lambda b: (0, 0)),
            pl.BlockSpec(w4.shape, lambda b: (0, 0)),
            pl.BlockSpec(b4.shape, lambda b: (0, 0)),
            pl.BlockSpec(w_head.shape, lambda b: (0, 0)),
            pl.BlockSpec(b_head.shape, lambda b: (0, 0)),
        ],
        out_specs=pl.BlockSpec((None, 1, ncls), lambda b: (b, 0, 0)),
        scratch_shapes=[
            pltpu.VMEM((9 * c0, n1), jnp.bfloat16),   # conv1 im2col
            pltpu.VMEM((9 * c1, n1), jnp.bfloat16),   # conv2 im2col
            pltpu.VMEM((9 * c2, n2), jnp.bfloat16),   # conv3 im2col
            pltpu.VMEM((9 * c3, n3), jnp.bfloat16),   # conv4 im2col
            pltpu.VMEM((c1, l1), jnp.bfloat16),       # conv2 padded input
            pltpu.VMEM((c2, l2), jnp.bfloat16),       # conv3 padded input
            pltpu.VMEM((c3, l3), jnp.bfloat16),       # conv4 padded input
        ],
        compiler_params=pltpu.CompilerParams(
            dimension_semantics=("parallel",)),       # one image per core on v7x
    )(x, mask1, w1, b1, w2, b2, t1, w3, b3, t2, w4, b4, w_head, b_head)
    return out.reshape(B, ncls)


# ----------------------------------------------------------------------------
# Host-side parameter prep (BN fold, tap flattening, pooling selection matrices)
# ----------------------------------------------------------------------------
def _interior_mask(h, w):
    m = np.zeros((h + 2, w + 2), np.float32)
    m[1:h + 1, 1:w + 1] = 1.0
    return jnp.asarray(m.reshape(1, -1))


def _pool_selection(h, w):
    """0/1 matrix mapping the 4-way window max (computed at all flat padded positions of
    an (h, w) conv output) to the next conv's padded+extended flat input buffer."""
    hp, wp = h + 2, w + 2
    hn, wn = h // 2, w // 2
    hpn, wpn = hn + 2, wn + 2
    en = wpn + 1
    lm = hp * wp - wp - 1
    ln = hpn * wpn + 2 * en
    t = np.zeros((lm, ln), np.float32)
    for pi in range(hn):
        for pj in range(wn):
            q = (2 * pi + 1) * wp + (2 * pj + 1)
            c = en + (pi + 1) * wpn + (pj + 1)
            t[q, c] = 1.0
    return jnp.asarray(t, jnp.bfloat16)


def prep_params(conv_params, lin_wt, lin_b, H, W):
    conv_prepped = []
    for w, scale, bias in conv_params:
        cin, cout = w.shape[2], w.shape[3]
        w_folded = (w * scale).reshape(9 * cin, cout).T.astype(jnp.bfloat16)  # (Cout,9Cin)
        conv_prepped.append((w_folded, bias.reshape(cout, 1).astype(jnp.float32)))
    n_pool_windows = (H // 8) * (W // 8)
    w_head = (lin_wt / float(n_pool_windows)).astype(jnp.float32)             # (C4, ncls)
    b_head = lin_b.reshape(1, -1).astype(jnp.float32)
    mask1 = _interior_mask(H, W)
    t1 = _pool_selection(H, W)            # pool after conv2 (H x W -> H/2 x W/2)
    t2 = _pool_selection(H // 2, W // 2)  # pool after conv3
    return tuple(conv_prepped), w_head, b_head, mask1, t1, t2


def init_params(key, n_channels, bw, n_classes):
    eps = 1e-5
    dims = [(n_channels, bw), (bw, bw), (bw, 2 * bw), (2 * bw, 4 * bw)]
    conv_params = []
    for cin, cout in dims:
        key, k1, k2, k3, k4, k5, k6 = jax.random.split(key, 7)
        w = jax.random.normal(k1, (3, 3, cin, cout), jnp.float32) * 0.1   # HWIO
        conv_b = jax.random.normal(k2, (cout,), jnp.float32) * 0.1
        gamma = 1.0 + 0.1 * jax.random.normal(k3, (cout,), jnp.float32)
        beta = 0.1 * jax.random.normal(k4, (cout,), jnp.float32)
        r_mean = 0.1 * jax.random.normal(k5, (cout,), jnp.float32)
        r_var = 0.5 + 0.5 * jnp.abs(jax.random.normal(k6, (cout,), jnp.float32))
        scale = gamma * jax.lax.rsqrt(r_var + eps)
        bias = (conv_b - r_mean) * scale + beta
        conv_params.append((w, scale, bias))
    key, kw, kb = jax.random.split(key, 3)
    lin_w = jax.random.normal(kw, (n_classes, 4 * bw), jnp.float32) * 0.1  # PyTorch (out, in)
    lin_b = jax.random.normal(kb, (n_classes,), jnp.float32) * 0.1
    return conv_params, lin_w.T, lin_b


# ----------------------------------------------------------------------------
# Pure-JAX f32 reference for verification
# ----------------------------------------------------------------------------
def reference_forward(x_nchw, conv_params, lin_wt, lin_b):
    x = jnp.transpose(x_nchw, (0, 2, 3, 1)).astype(jnp.float32)

    def conv_bn_relu(x, w, s, b):
        y = jax.lax.conv_general_dilated(
            x, w, (1, 1), "SAME", dimension_numbers=("NHWC", "HWIO", "NHWC"))
        return jnp.maximum(y * s.reshape(1, 1, 1, -1) + b.reshape(1, 1, 1, -1), 0.0)

    def pool(x):
        B, H, W, C = x.shape
        return jnp.max(x.reshape(B, H // 2, 2, W // 2, 2, C), axis=(2, 4))

    (w1, s1, b1), (w2, s2, b2), (w3, s3, b3), (w4, s4, b4) = conv_params
    x = conv_bn_relu(x, w1, s1, b1)
    x = conv_bn_relu(x, w2, s2, b2)
    x = pool(x)
    x = conv_bn_relu(x, w3, s3, b3)
    x = pool(x)
    x = conv_bn_relu(x, w4, s4, b4)
    x = pool(x)
    pooled = jnp.mean(x, axis=(1, 2))
    return pooled @ lin_wt + lin_b


if __name__ == "__main__":
    B, n_channels, H, W = 2, 4, 16, 16
    bw, n_classes = 8, 10

    key = jax.random.PRNGKey(0)
    key, kx = jax.random.split(key)
    x_nchw = jax.random.normal(kx, (B, n_channels, H, W), jnp.float32)

    conv_params, lin_wt, lin_b = init_params(key, n_channels, bw, n_classes)
    conv_prepped, w_head, b_head, mask1, t1, t2 = prep_params(
        conv_params, lin_wt, lin_b, H, W)

    out = simple_convnet_forward(x_nchw, conv_prepped, w_head, b_head, mask1, t1, t2)
    out = jax.block_until_ready(out)

    ref = reference_forward(x_nchw, conv_params, lin_wt, lin_b)
    assert out.shape == (B, n_classes), out.shape
    # bf16 weight/activation storage -> compare against the f32 reference with a
    # correspondingly relaxed tolerance.
    assert jnp.allclose(out, ref, rtol=2e-2, atol=2e-2), (out, ref)

    print("KERNEL_OK")
</pallas_src>

<mosaic_0001>
module attributes {stable_mosaic.version = 11 : i64} {
  func.func @_convnet_kernel(%arg0: i32, %arg1: memref<1x4x362xbf16, #tpu.memory_space<vmem>>, %arg2: memref<1x324xf32, #tpu.memory_space<vmem>>, %arg3: memref<8x36xbf16, #tpu.memory_space<vmem>>, %arg4: memref<8x1xf32, #tpu.memory_space<vmem>>, %arg5: memref<8x72xbf16, #tpu.memory_space<vmem>>, %arg6: memref<8x1xf32, #tpu.memory_space<vmem>>, %arg7: memref<305x122xbf16, #tpu.memory_space<vmem>>, %arg8: memref<16x72xbf16, #tpu.memory_space<vmem>>, %arg9: memref<16x1xf32, #tpu.memory_space<vmem>>, %arg10: memref<89x50xbf16, #tpu.memory_space<vmem>>, %arg11: memref<32x144xbf16, #tpu.memory_space<vmem>>, %arg12: memref<32x1xf32, #tpu.memory_space<vmem>>, %arg13: memref<32x10xf32, #tpu.memory_space<vmem>>, %arg14: memref<1x10xf32, #tpu.memory_space<vmem>>, %arg15: memref<1x1x10xf32, #tpu.memory_space<vmem>>, %arg16: memref<36x324xbf16, #tpu.memory_space<vmem>>, %arg17: memref<72x324xbf16, #tpu.memory_space<vmem>>, %arg18: memref<72x100xbf16, #tpu.memory_space<vmem>>, %arg19: memref<144x36xbf16, #tpu.memory_space<vmem>>, %arg20: memref<8x362xbf16, #tpu.memory_space<vmem>>, %arg21: memref<8x122xbf16, #tpu.memory_space<vmem>>, %arg22: memref<16x50xbf16, #tpu.memory_space<vmem>>) attributes {dimension_semantics = [#tpu.dimension_semantics<parallel>], iteration_bounds = array<i64: 2>, scalar_prefetch = 0 : i64, scratch_operands = 7 : i64, tpu.core_type = #tpu.core_type<tc>, window_params = [{transform_indices = @transform_0, window_bounds = array<i64: 1, 4, 362>}, {pipeline_mode = #tpu.pipeline_mode<synchronous>, transform_indices = @transform_1, window_bounds = array<i64: 1, 324>}, {pipeline_mode = #tpu.pipeline_mode<synchronous>, transform_indices = @transform_2, window_bounds = array<i64: 8, 36>}, {pipeline_mode = #tpu.pipeline_mode<synchronous>, transform_indices = @transform_3, window_bounds = array<i64: 8, 1>}, {pipeline_mode = #tpu.pipeline_mode<synchronous>, transform_indices = @transform_4, window_bounds = array<i64: 8, 72>}, {pipeline_mode = #tpu.pipeline_mode<synchronous>, transform_indices = @transform_5, window_bounds = array<i64: 8, 1>}, {pipeline_mode = #tpu.pipeline_mode<synchronous>, transform_indices = @transform_6, window_bounds = array<i64: 305, 122>}, {pipeline_mode = #tpu.pipeline_mode<synchronous>, transform_indices = @transform_7, window_bounds = array<i64: 16, 72>}, {pipeline_mode = #tpu.pipeline_mode<synchronous>, transform_indices = @transform_8, window_bounds = array<i64: 16, 1>}, {pipeline_mode = #tpu.pipeline_mode<synchronous>, transform_indices = @transform_9, window_bounds = array<i64: 89, 50>}, {pipeline_mode = #tpu.pipeline_mode<synchronous>, transform_indices = @transform_10, window_bounds = array<i64: 32, 144>}, {pipeline_mode = #tpu.pipeline_mode<synchronous>, transform_indices = @transform_11, window_bounds = array<i64: 32, 1>}, {pipeline_mode = #tpu.pipeline_mode<synchronous>, transform_indices = @transform_12, window_bounds = array<i64: 32, 10>}, {pipeline_mode = #tpu.pipeline_mode<synchronous>, transform_indices = @transform_13, window_bounds = array<i64: 1, 10>}, {transform_indices = @transform_14, window_bounds = array<i64: 1, 1, 10>}]} {
    %cst = arith.constant 0.000000e+00 : bf16
    %0 = vector.broadcast %cst : bf16 to vector<8x362xbf16>
    %c0 = arith.constant 0 : index
    %c0_0 = arith.constant 0 : index
    %1 = vector.load %arg20[%c0, %c0_0] : memref<8x362xbf16, #tpu.memory_space<vmem>>, vector<8x362xbf16>
    tpu.vector_store %arg20[%c0, %c0_0], %0 {strides = array<i32>} : memref<8x362xbf16, #tpu.memory_space<vmem>>, vector<8x362xbf16>,
    %c0_1 = arith.constant 0 : index
    %c0_2 = arith.constant 0 : index
    %c0_3 = arith.constant 0 : index
    %2 = vector.load %arg1[%c0_1, %c0_2, %c0_3] : memref<1x4x362xbf16, #tpu.memory_space<vmem>>, vector<1x4x324xbf16>
    %3 = vector.shape_cast %2 : vector<1x4x324xbf16> to vector<4x324xbf16>
    %c0_4 = arith.constant 0 : index
    %c0_5 = arith.constant 0 : index
    %4 = vector.load %arg16[%c0_4, %c0_5] : memref<36x324xbf16, #tpu.memory_space<vmem>>, vector<4x324xbf16>
    tpu.vector_store %arg16[%c0_4, %c0_5], %3 {strides = array<i32>} : memref<36x324xbf16, #tpu.memory_space<vmem>>, vector<4x324xbf16>,
    %c0_6 = arith.constant 0 : index
    %c0_7 = arith.constant 0 : index
    %c1 = arith.constant 1 : index
    %5 = vector.load %arg1[%c0_6, %c0_7, %c1] : memref<1x4x362xbf16, #tpu.memory_space<vmem>>, vector<1x4x324xbf16>
    %6 = vector.shape_cast %5 : vector<1x4x324xbf16> to vector<4x324xbf16>
    %c4 = arith.constant 4 : index
    %c0_8 = arith.constant 0 : index
    %7 = vector.load %arg16[%c4, %c0_8] : memref<36x324xbf16, #tpu.memory_space<vmem>>, vector<4x324xbf16>
    tpu.vector_store %arg16[%c4, %c0_8], %6 {strides = array<i32>} : memref<36x324xbf16, #tpu.memory_space<vmem>>, vector<4x324xbf16>,
    %c0_9 = arith.constant 0 : index
    %c0_10 = arith.constant 0 : index
    %c2 = arith.constant 2 : index
    %8 = vector.load %arg1[%c0_9, %c0_10, %c2] : memref<1x4x362xbf16, #tpu.memory_space<vmem>>, vector<1x4x324xbf16>
    %9 = vector.shape_cast %8 : vector<1x4x324xbf16> to vector<4x324xbf16>
    %c8 = arith.constant 8 : index
    %c0_11 = arith.constant 0 : index
    %10 = vector.load %arg16[%c8, %c0_11] : memref<36x324xbf16, #tpu.memory_space<vmem>>, vector<4x324xbf16>
    tpu.vector_store %arg16[%c8, %c0_11], %9 {strides = array<i32>} : memref<36x324xbf16, #tpu.memory_space<vmem>>, vector<4x324xbf16>,
    %c0_12 = arith.constant 0 : index
    %c0_13 = arith.constant 0 : index
    %c18 = arith.constant 18 : index
    %11 = vector.load %arg1[%c0_12, %c0_13, %c18] : memref<1x4x362xbf16, #tpu.memory_space<vmem>>, vector<1x4x324xbf16>
    %12 = vector.shape_cast %11 : vector<1x4x324xbf16> to vector<4x324xbf16>
    %c12 = arith.constant 12 : index
    %c0_14 = arith.constant 0 : index
    %13 = vector.load %arg16[%c12, %c0_14] : memref<36x324xbf16, #tpu.memory_space<vmem>>, vector<4x324xbf16>
    tpu.vector_store %arg16[%c12, %c0_14], %12 {strides = array<i32>} : memref<36x324xbf16, #tpu.memory_space<vmem>>, vector<4x324xbf16>,
    %c0_15 = arith.constant 0 : index
    %c0_16 = arith.constant 0 : index
    %c19 = arith.constant 19 : index
    %14 = vector.load %arg1[%c0_15, %c0_16, %c19] : memref<1x4x362xbf16, #tpu.memory_space<vmem>>, vector<1x4x324xbf16>
    %15 = vector.shape_cast %14 : vector<1x4x324xbf16> to vector<4x324xbf16>
    %c16 = arith.constant 16 : index
    %c0_17 = arith.constant 0 : index
    %16 = vector.load %arg16[%c16, %c0_17] : memref<36x324xbf16, #tpu.memory_space<vmem>>, vector<4x324xbf16>
    tpu.vector_store %arg16[%c16, %c0_17], %15 {strides = array<i32>} : memref<36x324xbf16, #tpu.memory_space<vmem>>, vector<4x324xbf16>,
    %c0_18 = arith.constant 0 : index
    %c0_19 = arith.constant 0 : index
    %c20 = arith.constant 20 : index
    %17 = vector.load %arg1[%c0_18, %c0_19, %c20] : memref<1x4x362xbf16, #tpu.memory_space<vmem>>, vector<1x4x324xbf16>
    %18 = vector.shape_cast %17 : vector<1x4x324xbf16> to vector<4x324xbf16>
    %c20_20 = arith.constant 20 : index
    %c0_21 = arith.constant 0 : index
    %19 = vector.load %arg16[%c20_20, %c0_21] : memref<36x324xbf16, #tpu.memory_space<vmem>>, vector<4x324xbf16>
    tpu.vector_store %arg16[%c20_20, %c0_21], %18 {strides = array<i32>} : memref<36x324xbf16, #tpu.memory_space<vmem>>, vector<4x324xbf16>,
    %c0_22 = arith.constant 0 : index
    %c0_23 = arith.constant 0 : index
    %c36 = arith.constant 36 : index
    %20 = vector.load %arg1[%c0_22, %c0_23, %c36] : memref<1x4x362xbf16, #tpu.memory_space<vmem>>, vector<1x4x324xbf16>
    %21 = vector.shape_cast %20 : vector<1x4x324xbf16> to vector<4x324xbf16>
    %c24 = arith.constant 24 : index
    %c0_24 = arith.constant 0 : index
    %22 = vector.load %arg16[%c24, %c0_24] : memref<36x324xbf16, #tpu.memory_space<vmem>>, vector<4x324xbf16>
    tpu.vector_store %arg16[%c24, %c0_24], %21 {strides = array<i32>} : memref<36x324xbf16, #tpu.memory_space<vmem>>, vector<4x324xbf16>,
    %c0_25 = arith.constant 0 : index
    %c0_26 = arith.constant 0 : index
    %c37 = arith.constant 37 : index
    %23 = vector.load %arg1[%c0_25, %c0_26, %c37] : memref<1x4x362xbf16, #tpu.memory_space<vmem>>, vector<1x4x324xbf16>
    %24 = vector.shape_cast %23 : vector<1x4x324xbf16> to vector<4x324xbf16>
    %c28 = arith.constant 28 : index
    %c0_27 = arith.constant 0 : index
    %25 = vector.load %arg16[%c28, %c0_27] : memref<36x324xbf16, #tpu.memory_space<vmem>>, vector<4x324xbf16>
    tpu.vector_store %arg16[%c28, %c0_27], %24 {strides = array<i32>} : memref<36x324xbf16, #tpu.memory_space<vmem>>, vector<4x324xbf16>,
    %c0_28 = arith.constant 0 : index
    %c0_29 = arith.constant 0 : index
    %c38 = arith.constant 38 : index
    %26 = vector.load %arg1[%c0_28, %c0_29, %c38] : memref<1x4x362xbf16, #tpu.memory_space<vmem>>, vector<1x4x324xbf16>
    %27 = vector.shape_cast %26 : vector<1x4x324xbf16> to vector<4x324xbf16>
    %c32 = arith.constant 32 : index
    %c0_30 = arith.constant 0 : index
    %28 = vector.load %arg16[%c32, %c0_30] : memref<36x324xbf16, #tpu.memory_space<vmem>>, vector<4x324xbf16>
    tpu.vector_store %arg16[%c32, %c0_30], %27 {strides = array<i32>} : memref<36x324xbf16, #tpu.memory_space<vmem>>, vector<4x324xbf16>,
    %c0_31 = arith.constant 0 : index
    %c0_32 = arith.constant 0 : index
    %29 = vector.load %arg3[%c0_31, %c0_32] : memref<8x36xbf16, #tpu.memory_space<vmem>>, vector<8x36xbf16>
    %c0_33 = arith.constant 0 : index
    %c0_34 = arith.constant 0 : index
    %30 = vector.load %arg16[%c0_33, %c0_34] : memref<36x324xbf16, #tpu.memory_space<vmem>>, vector<36x324xbf16>
    %cst_35 = arith.constant dense<0.000000e+00> : vector<8x324xf32>
    %31 = tpu.matmul %29, %30, %cst_35 {dimension_numbers = #tpu.dot_dimension_numbers<[1], [0], [0], [1], [0, 0, 1, 1], [], []>} : vector<8x36xbf16>, vector<36x324xbf16>, vector<8x324xf32> -> vector<8x324xf32>
    %c0_36 = arith.constant 0 : index
    %c0_37 = arith.constant 0 : index
    %32 = vector.load %arg4[%c0_36, %c0_37] : memref<8x1xf32, #tpu.memory_space<vmem>>, vector<8x1xf32>
    %33 = vector.broadcast %32 : vector<8x1xf32> to vector<8x324xf32>
    %34 = arith.addf %31, %33 : vector<8x324xf32>
    %cst_38 = arith.constant 0.000000e+00 : f32
    %35 = vector.broadcast %cst_38 : f32 to vector<8x324xf32>
    %36 = arith.maximumf %34, %35 : vector<8x324xf32>
    %c0_39 = arith.constant 0 : index
    %c0_40 = arith.constant 0 : index
    %37 = vector.load %arg2[%c0_39, %c0_40] : memref<1x324xf32, #tpu.memory_space<vmem>>, vector<1x324xf32>
    %38 = vector.broadcast %37 : vector<1x324xf32> to vector<8x324xf32>
    %39 = arith.mulf %36, %38 : vector<8x324xf32>
    %40 = arith.truncf %39 : vector<8x324xf32> to vector<8x324xbf16>
    %c0_41 = arith.constant 0 : index
    %c19_42 = arith.constant 19 : index
    %41 = vector.load %arg20[%c0_41, %c19_42] : memref<8x362xbf16, #tpu.memory_space<vmem>>, vector<8x324xbf16>
    tpu.vector_store %arg20[%c0_41, %c19_42], %40 {strides = array<i32>} : memref<8x362xbf16, #tpu.memory_space<vmem>>, vector<8x324xbf16>,
    %c0_43 = arith.constant 0 : index
    %c0_44 = arith.constant 0 : index
    %42 = vector.load %arg20[%c0_43, %c0_44] : memref<8x362xbf16, #tpu.memory_space<vmem>>, vector<8x324xbf16>
    %c0_45 = arith.constant 0 : index
    %c0_46 = arith.constant 0 : index
    %43 = vector.load %arg17[%c0_45, %c0_46] : memref<72x324xbf16, #tpu.memory_space<vmem>>, vector<8x324xbf16>
    tpu.vector_store %arg17[%c0_45, %c0_46], %42 {strides = array<i32>} : memref<72x324xbf16, #tpu.memory_space<vmem>>, vector<8x324xbf16>,
    %c0_47 = arith.constant 0 : index
    %c1_48 = arith.constant 1 : index
    %44 = vector.load %arg20[%c0_47, %c1_48] : memref<8x362xbf16, #tpu.memory_space<vmem>>, vector<8x324xbf16>
    %c8_49 = arith.constant 8 : index
    %c0_50 = arith.constant 0 : index
    %45 = vector.load %arg17[%c8_49, %c0_50] : memref<72x324xbf16, #tpu.memory_space<vmem>>, vector<8x324xbf16>
    tpu.vector_store %arg17[%c8_49, %c0_50], %44 {strides = array<i32>} : memref<72x324xbf16, #tpu.memory_space<vmem>>, vector<8x324xbf16>,
    %c0_51 = arith.constant 0 : index
    %c2_52 = arith.constant 2 : index
    %46 = vector.load %arg20[%c0_51, %c2_52] : memref<8x362xbf16, #tpu.memory_space<vmem>>, vector<8x324xbf16>
    %c16_53 = arith.constant 16 : index
    %c0_54 = arith.constant 0 : index
    %47 = vector.load %arg17[%c16_53, %c0_54] : memref<72x324xbf16, #tpu.memory_space<vmem>>, vector<8x324xbf16>
    tpu.vector_store %arg17[%c16_53, %c0_54], %46 {strides = array<i32>} : memref<72x324xbf16, #tpu.memory_space<vmem>>, vector<8x324xbf16>,
    %c0_55 = arith.constant 0 : index
    %c18_56 = arith.constant 18 : index
    %48 = vector.load %arg20[%c0_55, %c18_56] : memref<8x362xbf16, #tpu.memory_space<vmem>>, vector<8x324xbf16>
    %c24_57 = arith.constant 24 : index
    %c0_58 = arith.constant 0 : index
    %49 = vector.load %arg17[%c24_57, %c0_58] : memref<72x324xbf16, #tpu.memory_space<vmem>>, vector<8x324xbf16>
    tpu.vector_store %arg17[%c24_57, %c0_58], %48 {strides = array<i32>} : memref<72x324xbf16, #tpu.memory_space<vmem>>, vector<8x324xbf16>,
    %c0_59 = arith.constant 0 : index
    %c19_60 = arith.constant 19 : index
    %50 = vector.load %arg20[%c0_59, %c19_60] : memref<8x362xbf16, #tpu.memory_space<vmem>>, vector<8x324xbf16>
    %c32_61 = arith.constant 32 : index
    %c0_62 = arith.constant 0 : index
    %51 = vector.load %arg17[%c32_61, %c0_62] : memref<72x324xbf16, #tpu.memory_space<vmem>>, vector<8x324xbf16>
    tpu.vector_store %arg17[%c32_61, %c0_62], %50 {strides = array<i32>} : memref<72x324xbf16, #tpu.memory_space<vmem>>, vector<8x324xbf16>,
    %c0_63 = arith.constant 0 : index
    %c20_64 = arith.constant 20 : index
    %52 = vector.load %arg20[%c0_63, %c20_64] : memref<8x362xbf16, #tpu.memory_space<vmem>>, vector<8x324xbf16>
    %c40 = arith.constant 40 : index
    %c0_65 = arith.constant 0 : index
    %53 = vector.load %arg17[%c40, %c0_65] : memref<72x324xbf16, #tpu.memory_space<vmem>>, vector<8x324xbf16>
    tpu.vector_store %arg17[%c40, %c0_65], %52 {strides = array<i32>} : memref<72x324xbf16, #tpu.memory_space<vmem>>, vector<8x324xbf16>,
    %c0_66 = arith.constant 0 : index
    %c36_67 = arith.constant 36 : index
    %54 = vector.load %arg20[%c0_66, %c36_67] : memref<8x362xbf16, #tpu.memory_space<vmem>>, vector<8x324xbf16>
    %c48 = arith.constant 48 : index
    %c0_68 = arith.constant 0 : index
    %55 = vector.load %arg17[%c48, %c0_68] : memref<72x324xbf16, #tpu.memory_space<vmem>>, vector<8x324xbf16>
    tpu.vector_store %arg17[%c48, %c0_68], %54 {strides = array<i32>} : memref<72x324xbf16, #tpu.memory_space<vmem>>, vector<8x324xbf16>,
    %c0_69 = arith.constant 0 : index
    %c37_70 = arith.constant 37 : index
    %56 = vector.load %arg20[%c0_69, %c37_70] : memref<8x362xbf16, #tpu.memory_space<vmem>>, vector<8x324xbf16>
    %c56 = arith.constant 56 : index
    %c0_71 = arith.constant 0 : index
    %57 = vector.load %arg17[%c56, %c0_71] : memref<72x324xbf16, #tpu.memory_space<vmem>>, vector<8x324xbf16>
    tpu.vector_store %arg17[%c56, %c0_71], %56 {strides = array<i32>} : memref<72x324xbf16, #tpu.memory_space<vmem>>, vector<8x324xbf16>,
    %c0_72 = arith.constant 0 : index
    %c38_73 = arith.constant 38 : index
    %58 = vector.load %arg20[%c0_72, %c38_73] : memref<8x362xbf16, #tpu.memory_space<vmem>>, vector<8x324xbf16>
    %c64 = arith.constant 64 : index
    %c0_74 = arith.constant 0 : index
    %59 = vector.load %arg17[%c64, %c0_74] : memref<72x324xbf16, #tpu.memory_space<vmem>>, vector<8x324xbf16>
    tpu.vector_store %arg17[%c64, %c0_74], %58 {strides = array<i32>} : memref<72x324xbf16, #tpu.memory_space<vmem>>, vector<8x324xbf16>,
    %c0_75 = arith.constant 0 : index
    %c0_76 = arith.constant 0 : index
    %60 = vector.load %arg5[%c0_75, %c0_76] : memref<8x72xbf16, #tpu.memory_space<vmem>>, vector<8x72xbf16>
    %c0_77 = arith.constant 0 : index
    %c0_78 = arith.constant 0 : index
    %61 = vector.load %arg17[%c0_77, %c0_78] : memref<72x324xbf16, #tpu.memory_space<vmem>>, vector<72x324xbf16>
    %cst_79 = arith.constant dense<0.000000e+00> : vector<8x324xf32>
    %62 = tpu.matmul %60, %61, %cst_79 {dimension_numbers = #tpu.dot_dimension_numbers<[1], [0], [0], [1], [0, 0, 1, 1], [], []>} : vector<8x72xbf16>, vector<72x324xbf16>, vector<8x324xf32> -> vector<8x324xf32>
    %c0_80 = arith.constant 0 : index
    %c0_81 = arith.constant 0 : index
    %63 = vector.load %arg6[%c0_80, %c0_81] : memref<8x1xf32, #tpu.memory_space<vmem>>, vector<8x1xf32>
    %64 = vector.broadcast %63 : vector<8x1xf32> to vector<8x324xf32>
    %65 = arith.addf %62, %64 : vector<8x324xf32>
    %cst_82 = arith.constant 0.000000e+00 : f32
    %66 = vector.broadcast %cst_82 : f32 to vector<8x324xf32>
    %67 = arith.maximumf %65, %66 : vector<8x324xf32>
    %68 = vector.extract_strided_slice %67 {offsets = [0, 0], sizes = [8, 305], strides = [1, 1]} : vector<8x324xf32> to vector<8x305xf32>
    %69 = vector.extract_strided_slice %67 {offsets = [0, 1], sizes = [8, 305], strides = [1, 1]} : vector<8x324xf32> to vector<8x305xf32>
    %70 = arith.maximumf %68, %69 : vector<8x305xf32>
    %71 = vector.extract_strided_slice %67 {offsets = [0, 18], sizes = [8, 305], strides = [1, 1]} : vector<8x324xf32> to vector<8x305xf32>
    %72 = vector.extract_strided_slice %67 {offsets = [0, 19], sizes = [8, 305], strides = [1, 1]} : vector<8x324xf32> to vector<8x305xf32>
    %73 = arith.maximumf %71, %72 : vector<8x305xf32>
    %74 = arith.maximumf %70, %73 : vector<8x305xf32>
    %75 = arith.truncf %74 : vector<8x305xf32> to vector<8x305xbf16>
    %c0_83 = arith.constant 0 : index
    %c0_84 = arith.constant 0 : index
    %76 = vector.load %arg7[%c0_83, %c0_84] : memref<305x122xbf16, #tpu.memory_space<vmem>>, vector<305x122xbf16>
    %cst_85 = arith.constant dense<0.000000e+00> : vector<8x122xf32>
    %77 = tpu.matmul %75, %76, %cst_85 {dimension_numbers = #tpu.dot_dimension_numbers<[1], [0], [0], [1], [0, 0, 1, 1], [], []>} : vector<8x305xbf16>, vector<305x122xbf16>, vector<8x122xf32> -> vector<8x122xf32>
    %78 = arith.truncf %77 : vector<8x122xf32> to vector<8x122xbf16>
    %c0_86 = arith.constant 0 : index
    %c0_87 = arith.constant 0 : index
    %79 = vector.load %arg21[%c0_86, %c0_87] : memref<8x122xbf16, #tpu.memory_space<vmem>>, vector<8x122xbf16>
    tpu.vector_store %arg21[%c0_86, %c0_87], %78 {strides = array<i32>} : memref<8x122xbf16, #tpu.memory_space<vmem>>, vector<8x122xbf16>,
    %c0_88 = arith.constant 0 : index
    %c0_89 = arith.constant 0 : index
    %80 = vector.load %arg21[%c0_88, %c0_89] : memref<8x122xbf16, #tpu.memory_space<vmem>>, vector<8x100xbf16>
    %c0_90 = arith.constant 0 : index
    %c0_91 = arith.constant 0 : index
    %81 = vector.load %arg18[%c0_90, %c0_91] : memref<72x100xbf16, #tpu.memory_space<vmem>>, vector<8x100xbf16>
    tpu.vector_store %arg18[%c0_90, %c0_91], %80 {strides = array<i32>} : memref<72x100xbf16, #tpu.memory_space<vmem>>, vector<8x100xbf16>,
    %c0_92 = arith.constant 0 : index
    %c1_93 = arith.constant 1 : index
    %82 = vector.load %arg21[%c0_92, %c1_93] : memref<8x122xbf16, #tpu.memory_space<vmem>>, vector<8x100xbf16>
    %c8_94 = arith.constant 8 : index
    %c0_95 = arith.constant 0 : index
    %83 = vector.load %arg18[%c8_94, %c0_95] : memref<72x100xbf16, #tpu.memory_space<vmem>>, vector<8x100xbf16>
    tpu.vector_store %arg18[%c8_94, %c0_95], %82 {strides = array<i32>} : memref<72x100xbf16, #tpu.memory_space<vmem>>, vector<8x100xbf16>,
    %c0_96 = arith.constant 0 : index
    %c2_97 = arith.constant 2 : index
    %84 = vector.load %arg21[%c0_96, %c2_97] : memref<8x122xbf16, #tpu.memory_space<vmem>>, vector<8x100xbf16>
    %c16_98 = arith.constant 16 : index
    %c0_99 = arith.constant 0 : index
    %85 = vector.load %arg18[%c16_98, %c0_99] : memref<72x100xbf16, #tpu.memory_space<vmem>>, vector<8x100xbf16>
    tpu.vector_store %arg18[%c16_98, %c0_99], %84 {strides = array<i32>} : memref<72x100xbf16, #tpu.memory_space<vmem>>, vector<8x100xbf16>,
    %c0_100 = arith.constant 0 : index
    %c10 = arith.constant 10 : index
    %86 = vector.load %arg21[%c0_100, %c10] : memref<8x122xbf16, #tpu.memory_space<vmem>>, vector<8x100xbf16>
    %c24_101 = arith.constant 24 : index
    %c0_102 = arith.constant 0 : index
    %87 = vector.load %arg18[%c24_101, %c0_102] : memref<72x100xbf16, #tpu.memory_space<vmem>>, vector<8x100xbf16>
    tpu.vector_store %arg18[%c24_101, %c0_102], %86 {strides = array<i32>} : memref<72x100xbf16, #tpu.memory_space<vmem>>, vector<8x100xbf16>,
    %c0_103 = arith.constant 0 : index
    %c11 = arith.constant 11 : index
    %88 = vector.load %arg21[%c0_103, %c11] : memref<8x122xbf16, #tpu.memory_space<vmem>>, vector<8x100xbf16>
    %c32_104 = arith.constant 32 : index
    %c0_105 = arith.constant 0 : index
    %89 = vector.load %arg18[%c32_104, %c0_105] : memref<72x100xbf16, #tpu.memory_space<vmem>>, vector<8x100xbf16>
    tpu.vector_store %arg18[%c32_104, %c0_105], %88 {strides = array<i32>} : memref<72x100xbf16, #tpu.memory_space<vmem>>, vector<8x100xbf16>,
    %c0_106 = arith.constant 0 : index
    %c12_107 = arith.constant 12 : index
    %90 = vector.load %arg21[%c0_106, %c12_107] : memref<8x122xbf16, #tpu.memory_space<vmem>>, vector<8x100xbf16>
    %c40_108 = arith.constant 40 : index
    %c0_109 = arith.constant 0 : index
    %91 = vector.load %arg18[%c40_108, %c0_109] : memref<72x100xbf16, #tpu.memory_space<vmem>>, vector<8x100xbf16>
    tpu.vector_store %arg18[%c40_108, %c0_109], %90 {strides = array<i32>} : memref<72x100xbf16, #tpu.memory_space<vmem>>, vector<8x100xbf16>,
    %c0_110 = arith.constant 0 : index
    %c20_111 = arith.constant 20 : index
    %92 = vector.load %arg21[%c0_110, %c20_111] : memref<8x122xbf16, #tpu.memory_space<vmem>>, vector<8x100xbf16>
    %c48_112 = arith.constant 48 : index
    %c0_113 = arith.constant 0 : index
    %93 = vector.load %arg18[%c48_112, %c0_113] : memref<72x100xbf16, #tpu.memory_space<vmem>>, vector<8x100xbf16>
    tpu.vector_store %arg18[%c48_112, %c0_113], %92 {strides = array<i32>} : memref<72x100xbf16, #tpu.memory_space<vmem>>, vector<8x100xbf16>,
    %c0_114 = arith.constant 0 : index
    %c21 = arith.constant 21 : index
    %94 = vector.load %arg21[%c0_114, %c21] : memref<8x122xbf16, #tpu.memory_space<vmem>>, vector<8x100xbf16>
    %c56_115 = arith.constant 56 : index
    %c0_116 = arith.constant 0 : index
    %95 = vector.load %arg18[%c56_115, %c0_116] : memref<72x100xbf16, #tpu.memory_space<vmem>>, vector<8x100xbf16>
    tpu.vector_store %arg18[%c56_115, %c0_116], %94 {strides = array<i32>} : memref<72x100xbf16, #tpu.memory_space<vmem>>, vector<8x100xbf16>,
    %c0_117 = arith.constant 0 : index
    %c22 = arith.constant 22 : index
    %96 = vector.load %arg21[%c0_117, %c22] : memref<8x122xbf16, #tpu.memory_space<vmem>>, vector<8x100xbf16>
    %c64_118 = arith.constant 64 : index
    %c0_119 = arith.constant 0 : index
    %97 = vector.load %arg18[%c64_118, %c0_119] : memref<72x100xbf16, #tpu.memory_space<vmem>>, vector<8x100xbf16>
    tpu.vector_store %arg18[%c64_118, %c0_119], %96 {strides = array<i32>} : memref<72x100xbf16, #tpu.memory_space<vmem>>, vector<8x100xbf16>,
    %c0_120 = arith.constant 0 : index
    %c0_121 = arith.constant 0 : index
    %98 = vector.load %arg8[%c0_120, %c0_121] : memref<16x72xbf16, #tpu.memory_space<vmem>>, vector<16x72xbf16>
    %c0_122 = arith.constant 0 : index
    %c0_123 = arith.constant 0 : index
    %99 = vector.load %arg18[%c0_122, %c0_123] : memref<72x100xbf16, #tpu.memory_space<vmem>>, vector<72x100xbf16>
    %cst_124 = arith.constant dense<0.000000e+00> : vector<16x100xf32>
    %100 = tpu.matmul %98, %99, %cst_124 {dimension_numbers = #tpu.dot_dimension_numbers<[1], [0], [0], [1], [0, 0, 1, 1], [], []>} : vector<16x72xbf16>, vector<72x100xbf16>, vector<16x100xf32> -> vector<16x100xf32>
    %c0_125 = arith.constant 0 : index
    %c0_126 = arith.constant 0 : index
    %101 = vector.load %arg9[%c0_125, %c0_126] : memref<16x1xf32, #tpu.memory_space<vmem>>, vector<16x1xf32>
    %102 = vector.broadcast %101 : vector<16x1xf32> to vector<16x100xf32>
    %103 = arith.addf %100, %102 : vector<16x100xf32>
    %cst_127 = arith.constant 0.000000e+00 : f32
    %104 = vector.broadcast %cst_127 : f32 to vector<16x100xf32>
    %105 = arith.maximumf %103, %104 : vector<16x100xf32>
    %106 = vector.extract_strided_slice %105 {offsets = [0, 0], sizes = [16, 89], strides = [1, 1]} : vector<16x100xf32> to vector<16x89xf32>
    %107 = vector.extract_strided_slice %105 {offsets = [0, 1], sizes = [16, 89], strides = [1, 1]} : vector<16x100xf32> to vector<16x89xf32>
    %108 = arith.maximumf %106, %107 : vector<16x89xf32>
    %109 = vector.extract_strided_slice %105 {offsets = [0, 10], sizes = [16, 89], strides = [1, 1]} : vector<16x100xf32> to vector<16x89xf32>
    %110 = vector.extract_strided_slice %105 {offsets = [0, 11], sizes = [16, 89], strides = [1, 1]} : vector<16x100xf32> to vector<16x89xf32>
    %111 = arith.maximumf %109, %110 : vector<16x89xf32>
    %112 = arith.maximumf %108, %111 : vector<16x89xf32>
    %113 = arith.truncf %112 : vector<16x89xf32> to vector<16x89xbf16>
    %c0_128 = arith.constant 0 : index
    %c0_129 = arith.constant 0 : index
    %114 = vector.load %arg10[%c0_128, %c0_129] : memref<89x50xbf16, #tpu.memory_space<vmem>>, vector<89x50xbf16>
    %cst_130 = arith.constant dense<0.000000e+00> : vector<16x50xf32>
    %115 = tpu.matmul %113, %114, %cst_130 {dimension_numbers = #tpu.dot_dimension_numbers<[1], [0], [0], [1], [0, 0, 1, 1], [], []>} : vector<16x89xbf16>, vector<89x50xbf16>, vector<16x50xf32> -> vector<16x50xf32>
    %116 = arith.truncf %115 : vector<16x50xf32> to vector<16x50xbf16>
    %c0_131 = arith.constant 0 : index
    %c0_132 = arith.constant 0 : index
    %117 = vector.load %arg22[%c0_131, %c0_132] : memref<16x50xbf16, #tpu.memory_space<vmem>>, vector<16x50xbf16>
    tpu.vector_store %arg22[%c0_131, %c0_132], %116 {strides = array<i32>} : memref<16x50xbf16, #tpu.memory_space<vmem>>, vector<16x50xbf16>,
    %c0_133 = arith.constant 0 : index
    %c0_134 = arith.constant 0 : index
    %118 = vector.load %arg22[%c0_133, %c0_134] : memref<16x50xbf16, #tpu.memory_space<vmem>>, vector<16x36xbf16>
    %c0_135 = arith.constant 0 : index
    %c0_136 = arith.constant 0 : index
    %119 = vector.load %arg19[%c0_135, %c0_136] : memref<144x36xbf16, #tpu.memory_space<vmem>>, vector<16x36xbf16>
    tpu.vector_store %arg19[%c0_135, %c0_136], %118 {strides = array<i32>} : memref<144x36xbf16, #tpu.memory_space<vmem>>, vector<16x36xbf16>,
    %c0_137 = arith.constant 0 : index
    %c1_138 = arith.constant 1 : index
    %120 = vector.load %arg22[%c0_137, %c1_138] : memref<16x50xbf16, #tpu.memory_space<vmem>>, vector<16x36xbf16>
    %c16_139 = arith.constant 16 : index
    %c0_140 = arith.constant 0 : index
    %121 = vector.load %arg19[%c16_139, %c0_140] : memref<144x36xbf16, #tpu.memory_space<vmem>>, vector<16x36xbf16>
    tpu.vector_store %arg19[%c16_139, %c0_140], %120 {strides = array<i32>} : memref<144x36xbf16, #tpu.memory_space<vmem>>, vector<16x36xbf16>,
    %c0_141 = arith.constant 0 : index
    %c2_142 = arith.constant 2 : index
    %122 = vector.load %arg22[%c0_141, %c2_142] : memref<16x50xbf16, #tpu.memory_space<vmem>>, vector<16x36xbf16>
    %c32_143 = arith.constant 32 : index
    %c0_144 = arith.constant 0 : index
    %123 = vector.load %arg19[%c32_143, %c0_144] : memref<144x36xbf16, #tpu.memory_space<vmem>>, vector<16x36xbf16>
    tpu.vector_store %arg19[%c32_143, %c0_144], %122 {strides = array<i32>} : memref<144x36xbf16, #tpu.memory_space<vmem>>, vector<16x36xbf16>,
    %c0_145 = arith.constant 0 : index
    %c6 = arith.constant 6 : index
    %124 = vector.load %arg22[%c0_145, %c6] : memref<16x50xbf16, #tpu.memory_space<vmem>>, vector<16x36xbf16>
    %c48_146 = arith.constant 48 : index
    %c0_147 = arith.constant 0 : index
    %125 = vector.load %arg19[%c48_146, %c0_147] : memref<144x36xbf16, #tpu.memory_space<vmem>>, vector<16x36xbf16>
    tpu.vector_store %arg19[%c48_146, %c0_147], %124 {strides = array<i32>} : memref<144x36xbf16, #tpu.memory_space<vmem>>, vector<16x36xbf16>,
    %c0_148 = arith.constant 0 : index
    %c7 = arith.constant 7 : index
    %126 = vector.load %arg22[%c0_148, %c7] : memref<16x50xbf16, #tpu.memory_space<vmem>>, vector<16x36xbf16>
    %c64_149 = arith.constant 64 : index
    %c0_150 = arith.constant 0 : index
    %127 = vector.load %arg19[%c64_149, %c0_150] : memref<144x36xbf16, #tpu.memory_space<vmem>>, vector<16x36xbf16>
    tpu.vector_store %arg19[%c64_149, %c0_150], %126 {strides = array<i32>} : memref<144x36xbf16, #tpu.memory_space<vmem>>, vector<16x36xbf16>,
    %c0_151 = arith.constant 0 : index
    %c8_152 = arith.constant 8 : index
    %128 = vector.load %arg22[%c0_151, %c8_152] : memref<16x50xbf16, #tpu.memory_space<vmem>>, vector<16x36xbf16>
    %c80 = arith.constant 80 : index
    %c0_153 = arith.constant 0 : index
    %129 = vector.load %arg19[%c80, %c0_153] : memref<144x36xbf16, #tpu.memory_space<vmem>>, vector<16x36xbf16>
    tpu.vector_store %arg19[%c80, %c0_153], %128 {strides = array<i32>} : memref<144x36xbf16, #tpu.memory_space<vmem>>, vector<16x36xbf16>,
    %c0_154 = arith.constant 0 : index
    %c12_155 = arith.constant 12 : index
    %130 = vector.load %arg22[%c0_154, %c12_155] : memref<16x50xbf16, #tpu.memory_space<vmem>>, vector<16x36xbf16>
    %c96 = arith.constant 96 : index
    %c0_156 = arith.constant 0 : index
    %131 = vector.load %arg19[%c96, %c0_156] : memref<144x36xbf16, #tpu.memory_space<vmem>>, vector<16x36xbf16>
    tpu.vector_store %arg19[%c96, %c0_156], %130 {strides = array<i32>} : memref<144x36xbf16, #tpu.memory_space<vmem>>, vector<16x36xbf16>,
    %c0_157 = arith.constant 0 : index
    %c13 = arith.constant 13 : index
    %132 = vector.load %arg22[%c0_157, %c13] : memref<16x50xbf16, #tpu.memory_space<vmem>>, vector<16x36xbf16>
    %c112 = arith.constant 112 : index
    %c0_158 = arith.constant 0 : index
    %133 = vector.load %arg19[%c112, %c0_158] : memref<144x36xbf16, #tpu.memory_space<vmem>>, vector<16x36xbf16>
    tpu.vector_store %arg19[%c112, %c0_158], %132 {strides = array<i32>} : memref<144x36xbf16, #tpu.memory_space<vmem>>, vector<16x36xbf16>,
    %c0_159 = arith.constant 0 : index
    %c14 = arith.constant 14 : index
    %134 = vector.load %arg22[%c0_159, %c14] : memref<16x50xbf16, #tpu.memory_space<vmem>>, vector<16x36xbf16>
    %c128 = arith.constant 128 : index
    %c0_160 = arith.constant 0 : index
    %135 = vector.load %arg19[%c128, %c0_160] : memref<144x36xbf16, #tpu.memory_space<vmem>>, vector<16x36xbf16>
    tpu.vector_store %arg19[%c128, %c0_160], %134 {strides = array<i32>} : memref<144x36xbf16, #tpu.memory_space<vmem>>, vector<16x36xbf16>,
    %c0_161 = arith.constant 0 : index
    %c0_162 = arith.constant 0 : index
    %136 = vector.load %arg11[%c0_161, %c0_162] : memref<32x144xbf16, #tpu.memory_space<vmem>>, vector<32x144xbf16>
    %c0_163 = arith.constant 0 : index
    %c0_164 = arith.constant 0 : index
    %137 = vector.load %arg19[%c0_163, %c0_164] : memref<144x36xbf16, #tpu.memory_space<vmem>>, vector<144x36xbf16>
    %cst_165 = arith.constant dense<0.000000e+00> : vector<32x36xf32>
    %138 = tpu.matmul %136, %137, %cst_165 {dimension_numbers = #tpu.dot_dimension_numbers<[1], [0], [0], [1], [0, 0, 1, 1], [], []>} : vector<32x144xbf16>, vector<144x36xbf16>, vector<32x36xf32> -> vector<32x36xf32>
    %c0_166 = arith.constant 0 : index
    %c0_167 = arith.constant 0 : index
    %139 = vector.load %arg12[%c0_166, %c0_167] : memref<32x1xf32, #tpu.memory_space<vmem>>, vector<32x1xf32>
    %140 = vector.broadcast %139 : vector<32x1xf32> to vector<32x36xf32>
    %141 = arith.addf %138, %140 : vector<32x36xf32>
    %cst_168 = arith.constant 0.000000e+00 : f32
    %142 = vector.broadcast %cst_168 : f32 to vector<32x36xf32>
    %143 = arith.maximumf %141, %142 : vector<32x36xf32>
    %144 = vector.extract_strided_slice %143 {offsets = [0, 0], sizes = [32, 29], strides = [1, 1]} : vector<32x36xf32> to vector<32x29xf32>
    %145 = vector.extract_strided_slice %143 {offsets = [0, 1], sizes = [32, 29], strides = [1, 1]} : vector<32x36xf32> to vector<32x29xf32>
    %146 = arith.maximumf %144, %145 : vector<32x29xf32>
    %147 = vector.extract_strided_slice %143 {offsets = [0, 6], sizes = [32, 29], strides = [1, 1]} : vector<32x36xf32> to vector<32x29xf32>
    %148 = vector.extract_strided_slice %143 {offsets = [0, 7], sizes = [32, 29], strides = [1, 1]} : vector<32x36xf32> to vector<32x29xf32>
    %149 = arith.maximumf %147, %148 : vector<32x29xf32>
    %150 = arith.maximumf %146, %149 : vector<32x29xf32>
    %151 = vector.extract_strided_slice %150 {offsets = [0, 7], sizes = [32, 1], strides = [1, 1]} : vector<32x29xf32> to vector<32x1xf32>
    %152 = vector.extract_strided_slice %150 {offsets = [0, 9], sizes = [32, 1], strides = [1, 1]} : vector<32x29xf32> to vector<32x1xf32>
    %153 = arith.addf %151, %152 : vector<32x1xf32>
    %154 = vector.extract_strided_slice %150 {offsets = [0, 19], sizes = [32, 1], strides = [1, 1]} : vector<32x29xf32> to vector<32x1xf32>
    %155 = arith.addf %153, %154 : vector<32x1xf32>
    %156 = vector.extract_strided_slice %150 {offsets = [0, 21], sizes = [32, 1], strides = [1, 1]} : vector<32x29xf32> to vector<32x1xf32>
    %157 = arith.addf %155, %156 : vector<32x1xf32>
    %c0_169 = arith.constant 0 : index
    %c0_170 = arith.constant 0 : index
    %158 = vector.load %arg13[%c0_169, %c0_170] : memref<32x10xf32, #tpu.memory_space<vmem>>, vector<32x10xf32>
    %159 = vector.broadcast %157 : vector<32x1xf32> to vector<32x10xf32>
    %160 = arith.mulf %158, %159 : vector<32x10xf32>
    %cst_171 = arith.constant dense<0.000000e+00> : vector<10xf32>
    %161 = vector.multi_reduction <add>, %160, %cst_171 [0] : vector<32x10xf32> to vector<10xf32>
    %162 = vector.shape_cast %161 : vector<10xf32> to vector<1x10xf32>
    %c0_172 = arith.constant 0 : index
    %c0_173 = arith.constant 0 : index
    %163 = vector.load %arg14[%c0_172, %c0_173] : memref<1x10xf32, #tpu.memory_space<vmem>>, vector<1x10xf32>
    %164 = arith.addf %162, %163 : vector<1x10xf32>
    %c0_174 = arith.constant 0 : index
    %c0_175 = arith.constant 0 : index
    %c0_176 = arith.constant 0 : index
    %165 = vector.load %arg15[%c0_174, %c0_175, %c0_176] : memref<1x1x10xf32, #tpu.memory_space<vmem>>, vector<1x1x10xf32>
    %166 = vector.shape_cast %165 : vector<1x1x10xf32> to vector<1x10xf32>
    %167 = vector.shape_cast %164 : vector<1x10xf32> to vector<1x1x10xf32>
    tpu.vector_store %arg15[%c0_174, %c0_175, %c0_176], %167 {strides = array<i32>} : memref<1x1x10xf32, #tpu.memory_space<vmem>>, vector<1x1x10xf32>,
    return
  }
  func.func @transform_0(%arg0: i32) -> (i32, i32, i32) {
    %c0_i32 = arith.constant 0 : i32
    %c0_i32_0 = arith.constant 0 : i32
    %c0_i32_1 = arith.constant 0 : i32
    return %arg0, %c0_i32, %c0_i32_0 : i32, i32, i32
  }
  func.func @transform_1(%arg0: i32) -> (i32, i32) {
    %c0_i32 = arith.constant 0 : i32
    %c0_i32_0 = arith.constant 0 : i32
    %c0_i32_1 = arith.constant 0 : i32
    return %c0_i32, %c0_i32_0 : i32, i32
  }
  func.func @transform_2(%arg0: i32) -> (i32, i32) {
    %c0_i32 = arith.constant 0 : i32
    %c0_i32_0 = arith.constant 0 : i32
    %c0_i32_1 = arith.constant 0 : i32
    return %c0_i32, %c0_i32_0 : i32, i32
  }
  func.func @transform_3(%arg0: i32) -> (i32, i32) {
    %c0_i32 = arith.constant 0 : i32
    %c0_i32_0 = arith.constant 0 : i32
    %c0_i32_1 = arith.constant 0 : i32
    return %c0_i32, %c0_i32_0 : i32, i32
  }
  func.func @transform_4(%arg0: i32) -> (i32, i32) {
    %c0_i32 = arith.constant 0 : i32
    %c0_i32_0 = arith.constant 0 : i32
    %c0_i32_1 = arith.constant 0 : i32
    return %c0_i32, %c0_i32_0 : i32, i32
  }
  func.func @transform_5(%arg0: i32) -> (i32, i32) {
    %c0_i32 = arith.constant 0 : i32
    %c0_i32_0 = arith.constant 0 : i32
    %c0_i32_1 = arith.constant 0 : i32
    return %c0_i32, %c0_i32_0 : i32, i32
  }
  func.func @transform_6(%arg0: i32) -> (i32, i32) {
    %c0_i32 = arith.constant 0 : i32
    %c0_i32_0 = arith.constant 0 : i32
    %c0_i32_1 = arith.constant 0 : i32
    return %c0_i32, %c0_i32_0 : i32, i32
  }
  func.func @transform_7(%arg0: i32) -> (i32, i32) {
    %c0_i32 = arith.constant 0 : i32
    %c0_i32_0 = arith.constant 0 : i32
    %c0_i32_1 = arith.constant 0 : i32
    return %c0_i32, %c0_i32_0 : i32, i32
  }
  func.func @transform_8(%arg0: i32) -> (i32, i32) {
    %c0_i32 = arith.constant 0 : i32
    %c0_i32_0 = arith.constant 0 : i32
    %c0_i32_1 = arith.constant 0 : i32
    return %c0_i32, %c0_i32_0 : i32, i32
  }
  func.func @transform_9(%arg0: i32) -> (i32, i32) {
    %c0_i32 = arith.constant 0 : i32
    %c0_i32_0 = arith.constant 0 : i32
    %c0_i32_1 = arith.constant 0 : i32
    return %c0_i32, %c0_i32_0 : i32, i32
  }
  func.func @transform_10(%arg0: i32) -> (i32, i32) {
    %c0_i32 = arith.constant 0 : i32
    %c0_i32_0 = arith.constant 0 : i32
    %c0_i32_1 = arith.constant 0 : i32
    return %c0_i32, %c0_i32_0 : i32, i32
  }
  func.func @transform_11(%arg0: i32) -> (i32, i32) {
    %c0_i32 = arith.constant 0 : i32
    %c0_i32_0 = arith.constant 0 : i32
    %c0_i32_1 = arith.constant 0 : i32
    return %c0_i32, %c0_i32_0 : i32, i32
  }
  func.func @transform_12(%arg0: i32) -> (i32, i32) {
    %c0_i32 = arith.constant 0 : i32
    %c0_i32_0 = arith.constant 0 : i32
    %c0_i32_1 = arith.constant 0 : i32
    return %c0_i32, %c0_i32_0 : i32, i32
  }
  func.func @transform_13(%arg0: i32) -> (i32, i32) {
    %c0_i32 = arith.constant 0 : i32
    %c0_i32_0 = arith.constant 0 : i32
    %c0_i32_1 = arith.constant 0 : i32
    return %c0_i32, %c0_i32_0 : i32, i32
  }
  func.func @transform_14(%arg0: i32) -> (i32, i32, i32) {
    %c0_i32 = arith.constant 0 : i32
    %c0_i32_0 = arith.constant 0 : i32
    %c0_i32_1 = arith.constant 0 : i32
    return %arg0, %c0_i32, %c0_i32_0 : i32, i32, i32
  }
}

</mosaic_0001>

<bundles_post_ra>
// kernel: simple_convnet_forward.1
= control target key start
LH: loop header
LB: loop body
LE: loop exit
PB: predicated region body
PF: predicated region fallthrough
CT: control target
= control target key end

     0   :  { %s3206_s0 = inlined_call_operand.vmem [shape: bf16[2,4,362], index: 0, kind: input, shape index: {}]   ;;  %s3207_s1 = inlined_call_operand.vmem [shape: f32[1,324], index: 1, kind: input, shape index: {}]   ;;  %s3208_s2 = inlined_call_operand.vmem [shape: bf16[8,36], index: 2, kind: input, shape index: {}]   ;;  %s3209_s3 = inlined_call_operand.vmem [shape: f32[8,1], index: 3, kind: input, shape index: {}]   ;;  %s3210_s4 = inlined_call_operand.vmem [shape: bf16[8,72], index: 4, kind: input, shape index: {}]   ;;  %s3211_s5 = inlined_call_operand.vmem [shape: f32[8,1], index: 5, kind: input, shape index: {}]   ;;  %s3212_s6 = inlined_call_operand.vmem [shape: bf16[305,122], index: 6, kind: input, shape index: {}]   ;;  %s3213_s7 = inlined_call_operand.vmem [shape: bf16[16,72], index: 7, kind: input, shape index: {}]   ;;  %s3214_s8 = inlined_call_operand.vmem [shape: f32[16,1], index: 8, kind: input, shape index: {}]   ;;  %s3215_s9 = inlined_call_operand.vmem [shape: bf16[89,50], index: 9, kind: input, shape index: {}]   ;;  %s3216_s10 = inlined_call_operand.vmem [shape: bf16[32,144], index: 10, kind: input, shape index: {}]   ;;  %s3217_s11 = inlined_call_operand.vmem [shape: f32[32,1], index: 11, kind: input, shape index: {}]   ;;  %s3218_s12 = inlined_call_operand.vmem [shape: f32[32,10], index: 12, kind: input, shape index: {}]   ;;  %s3219_s13 = inlined_call_operand.vmem [shape: f32[1,10], index: 13, kind: input, shape index: {}]   ;;  %s3220_s14 = inlined_call_operand.hbm [shape: f32[2,1,10], index: 14, kind: output, shape index: {}]  }
   0x1   :  { %3243 = sst [smem:[#allocation12_spill]] %s3206_s0 }
   0x2   :  { %3244 = sst [smem:[#allocation13_spill]] %s3207_s1 }
   0x3   :  { %3245 = sst [smem:[#allocation14_spill]] %s3208_s2 }
   0x4   :  { %3246 = sst [smem:[#allocation15_spill]] %s3209_s3 }
   0x5   :  { %3247 = sst [smem:[#allocation16_spill]] %s3210_s4 }
   0x6   :  { %19 = vsyncpa [#allocation10], 0 }
   0x7   :  { %21 = vsyncpa [#allocation10 + $0x1], 0  ;;  %s2715_s29 = smov 0   ;;  %s2717_s30 = smov 0  }
   0x8   :  { %s2719_s15 = smov 0   ;;  %s2721_s16 = smov 0  }
   0x9 LB: > { %s2736_s17 = sadd.s32 4294967295, %s2612_s16   ;;  %s2199_s18 = sadd.s32 4294967294, %s2612_s16   ;;  %s2612_s16 = sphi %s2721_s16, %s3278_s16   ;;  %s2608_s15 = sphi %s2719_s15, %s3277_s15   ;;  %s2604_s30 = sphi %s2717_s30, %s3276_s30   ;;  %s2600_s29 = sphi %s2715_s29, %s3275_s29  }
   0xa   : > { %s2740_s19 = sadd.s32 1, %s2612_s16   ;;  %s333_s20 = sadd.s32 1, %s2608_s15 }
   0xb   : > { %s330_s21 = ssub.s32 %s2612_s16, %s2740_s19  ;;  %p343_p0 = scmp.ne.s32.totalorder %s2608_s15, %s2604_s30 }
   0xc   : > { %p331_p1 = scmp.eq.s32.totalorder %s330_s21, 0  ;;  %p344_p2 = scmp.eq.s32.totalorder %s2736_s17, 1 }
   0xd   : > { %p349_p3 = scmp.ne.s32.totalorder %s2604_s30, %s2600_s29  ;;  %p350_p4 = scmp.eq.s32.totalorder %s2199_s18, 1 }
   0xe   : > { %s2751_s22 = scalar_select %p331_p1, %s2608_s15, %s333_s20  }
   0xf   : > { %p2753_p5 = por %p344_p2, %p343_p0  ;;  %p2757_p6 = por %p350_p4, %p349_p3 }
  0x10   : > { %p2202_p7 = scmp.ge.s32.totalorder %s2612_s16, 1  ;;  %p415_p8 = scmp.lt.s32.totalorder %s2612_s16, 3 }
  0x12   : > { %p416_p9 = pnand %p2202_p7, %p415_p8 }
  0x13   : > { %p460_p10 = scmp.lt.s32.totalorder (!%p416_p9), %s2736_s17, 1  ;;  %v482_v0 = vlaneseq (!%p416_p9)  ;;  %v2614_v1 = vmov (!%p416_p9), 1983009808   ;;  %s3250_s0 = sld [smem:[#allocation12_spill]] (!%p416_p9)  ;;  %vm489_vm0 = vcmask (!%p416_p9), 549888   ;;  %v2623_v41 = vmov (!%p416_p9), 0  }
  0x14   : > { %419 = sbr.rel (%p416_p9) target bundleno = 3135 (0xc3f), region = 76  ;;  %v480_v2 = vunpack.c.l.s4 (!%p416_p9), %v2614_v1  ;;  %s3232_s20 = smov (!%p416_p9), 126   ;;  %836 = vmatprep.mubr.bf16.mxu0 (!%p416_p9), %v2623_v41  ;;  %466 = vst [vmem:[#allocation6] sm:$0xff] (!%p416_p9), %v2623_v41  ;;  %2464 = vset.pattern.permute.xlu0 (!%p416_p9), %v2623_v41  ;;  %v2624_v42 = vmov (!%p416_p9), 0.0   ;;  %vm2625_vm1 = vmmov (!%p416_p9), 0   ;;  %vm521_vm2 = vcmask (!%p416_p9), 551938  }
  0x15   : > { %v2765_v3 = vshrl.u32 (!%p416_p9), %v482_v0, 7  ;;  %s3230_s21 = smov (!%p416_p9), 127   ;;  %s3234_s27 = smov (!%p416_p9), 108   ;;  %2475 = vset.pattern.permute.xlu1 (!%p416_p9), %v2623_v41  ;;  %2343 = vmatprep.subr.bf16.mxu1 (!%p416_p9), %v2624_v42  ;;  %vm514_vm3 = vcmask (!%p416_p9), 1043456   ;;  %vm547_vm4 = vcmask (!%p416_p9), 1031168   ;;  %vm516_vm5 = vcmask (!%p416_p9), 1039360  }
  0x16   : > { %v481_v4 = vunpack.c.0.s8 (!%p416_p9), %v480_v2  ;;  %s3225_s28 = smov (!%p416_p9), 92   ;;  %2353 = vmatprep.mubr.msk.bf16.mxu1 (!%p416_p9), %vm2625_vm1, %v2624_v42  ;;  %s3251_s3 = sld [smem:[#allocation15_spill]] (!%p416_p9)  ;;  %vm607_vm6 = vcmask (!%p416_p9), 891904   ;;  %vm577_vm7 = vcmask (!%p416_p9), 900096   ;;  %vm637_vm8 = vcmask (!%p416_p9), 883712  }
  0x17   : > { %vm667_vm9 = vcmask (!%p416_p9), 752640   ;;  %vm697_vm10 = vcmask (!%p416_p9), 744448   ;;  %vm727_vm11 = vcmask (!%p416_p9), 736256   ;;  %vm794_vm12 = vcmask (!%p416_p9), 1041408   ;;  %s3252_s2 = sld [smem:[#allocation14_spill]] (!%p416_p9)  ;;  %s3253_s1 = sld [smem:[#allocation13_spill]] (!%p416_p9) }
  0x18   : > { %v2768_v5 = vsub.s32 (!%p416_p9), %v481_v4, %v2765_v3  ;;  %vm3227_vm13 = vcmask (!%p416_p9), 293888   ;;  %vm467_vm14 = vcmask (!%p416_p9), 863232   ;;  %vm929_vm15 = vcmask (!%p416_p9), 1043608   ;;  %s3258_s4 = sld [smem:[#allocation16_spill]] (!%p416_p9) }
  0x19   : > { %468 = vst.msk [vmem:[#allocation6 + $0x8] sm:$0xf] (!%p416_p9), %vm467_vm14, %v2623_v41  ;;  %vm933_vm14 = vcmask (!%p416_p9), 707584  }
  0x1b   : > { %s461_s25 = scalar_select %p460_p10, %s2736_s17, 1 }
  0x1c   : > { %v744_v43 = vld [vmem:[%s3251_s3] sm:$0xff]  ;;  %s2630_s3 = smov 106  }
  0x1d   : > { %s2399_s26 = smul.u32 6, %s461_s25  ;;  %s3235_s25 = smov 110  }
  0x1f   : > { %s2773_s18 = scalar_lea.vmem %s3250_s0, %s2399_s26  ;;  %s3221_s26 = smov 109  }
  0x20   : > { %v523_v6 = vld [vmem:[%s2773_s18] sm:$0x3f]  ;;  %s3260_s0 = smov 110  }
  0x21   : > { %v491_v7 = vld [vmem:[%s2773_s18] sm:$0x3f]  ;;  %v532_v9 = vrot.slane %v523_v6, %v2768_v5  ;;  %v525_v12 = vcombine.high %v523_v6, %v523_v6 }
  0x22   : > { %v553_v8 = vld [vmem:[%s2773_s18] sm:$0x3f]  ;;  %v507_v10 = vrot.slane %v491_v7, %v2768_v5  ;;  %v493_v14 = vcombine.low %v491_v7, %v491_v7 }
  0x23   : > { %v583_v11 = vld [vmem:[%s2773_s18] sm:$0x3f]  ;;  %540 = vrot.lane.b32.xlu1 %v532_v9, %s3232_s20  ;;  %v569_v15 = vrot.slane %v553_v8, %v2768_v5  ;;  %v539_v20 = vrot.slane %v525_v12, %v2768_v5  ;;  %v555_v22 = vcombine.low %v553_v8, %v553_v8 }
  0x24   : > { %v469_v13 = vld [vmem:[%s2773_s18] sm:$0x3f]  ;;  %510 = vrot.lane.b32.xlu0 %v507_v10, %s3230_s21  ;;  %v592_v16 = vrot.slane %v583_v11, %v2768_v5  ;;  %v585_v17 = vcombine.high %v583_v11, %v583_v11  ;;  %v500_v21 = vrot.slane %v493_v14, %v2768_v5 }
  0x25   : > { %2204 = vst.sshfl [vmem:[#allocation2] sm:$0xf pattern:$0x76325410] %v469_v13  ;;  %v613_v18 = vld [vmem:[%s2773_s18] sm:$0x3f]  ;;  %v471_v19 = vcombine.high %v469_v13, %v469_v13  ;;  %v562_v26 = vrot.slane %v555_v22, %v2768_v5 }
  0x26   : > { %v643_v24 = vld [vmem:[%s2773_s18] sm:$0x3f]  ;;  %v599_v25 = vrot.slane %v585_v17, %v2768_v5  ;;  %v615_v27 = vcombine.low %v613_v18, %v613_v18  ;;  %v629_v29 = vrot.slane %v613_v18, %v2768_v5 }
  0x27   : > { %572 = vrot.lane.b32.xlu1 %v569_v15, %s3235_s25  ;;  %v485_v23 = vrot.slane %v471_v19, %v2768_v5  ;;  %v673_v28 = vld [vmem:[%s2773_s18] sm:$0x3f]  ;;  %v645_v31 = vcombine.high %v643_v24, %v643_v24  ;;  %v652_v33 = vrot.slane %v643_v24, %v2768_v5 }
  0x28   : > { %600 = vrot.lane.b32.xlu0 %v592_v16, %s3221_s26  ;;  %v622_v30 = vrot.slane %v615_v27, %v2768_v5  ;;  %v675_v34 = vcombine.low %v673_v28, %v673_v28  ;;  %v703_v35 = vld [vmem:[%s2773_s18] sm:$0x3f]  ;;  %v689_v36 = vrot.slane %v673_v28, %v2768_v5  ;;  %s3228_s18 = smov 90  }
  0x29   : > { %490 = vst.msk [vmem:[#allocation2 + $0x8] sm:$0x3] %vm489_vm0, %v485_v23  ;;  %v659_v32 = vrot.slane %v645_v31, %v2768_v5  ;;  %v705_v38 = vcombine.high %v703_v35, %v703_v35  ;;  %v712_v40 = vrot.slane %v703_v35, %v2768_v5 }
  0x2a   : > { %v682_v37 = vrot.slane %v675_v34, %v2768_v5 }
  0x2b   : > { %542 = vrot.lane.b32.xlu1 %v539_v20, %s3232_s20  ;;  %v719_v39 = vrot.slane %v705_v38, %v2768_v5 }
  0x2c   : > { %508 = vrot.lane.b32.xlu0 %v500_v21, %s3230_s21 }
  0x2f   : > { %602 = vrot.lane.b32.xlu1 %v599_v25, %s3221_s26  ;;  %s3223_s26 = smov 91  }
  0x30   : > { %570 = vrot.lane.b32.xlu0 %v562_v26, %s3235_s25 }
  0x33   : > { %632 = vrot.lane.b32.xlu1 %v629_v29, %s3234_s27 }
  0x34   : > { %630 = vrot.lane.b32.xlu0 %v622_v30, %s3234_s27 }
  0x37   : > { %662 = vrot.lane.b32.xlu1 %v659_v32, %s3225_s28 }
  0x38   : > { %660 = vrot.lane.b32.xlu0 %v652_v33, %s3225_s28  ;;  %s3254_s28 = smov 109  }
  0x3b   : > { %692 = vrot.lane.b32.xlu1 %v689_v36, %s3223_s26 }
  0x3c   : > { %690 = vrot.lane.b32.xlu0 %v682_v37, %s3223_s26  ;;  %s2626_s26 = smov 19  }
  0x3f   : > { %722 = vrot.lane.b32.xlu1 %v719_v39, %s3228_s18  ;;  %v733_v39 = vld [vmem:[%s3252_s2] sm:$0xf]  ;;  %s3237_s2 = smov 116  }
  0x40   : > { %720 = vrot.lane.b32.xlu0 %v712_v40, %s3228_s18  ;;  %s3256_s18 = smov 91  }
  0x44   : > { %747 = vperm.xlu0 %2464, %v744_v43  }
  0x95   : > { %v541_v44 = vpop.permute.xlu1 %540 }
  0x96   : > { %v511_v45 = vpop.permute.xlu0 %510  ;;  %v544_v50 = vrot.slane %v541_v44, 4 }
  0x97   : > { %522 = vst.msk [vmem:[#allocation2 + $0x8] sm:$0xc] %vm521_vm2, %v511_v45  ;;  %v513_v51 = vrot.slane %v511_v45, 4 }
  0x99   : > { %v573_v46 = vpop.permute.xlu1 %572 }
  0x9a   : > { %v601_v47 = vpop.permute.xlu0 %600  ;;  %582 = vst.msk [vmem:[#allocation2 + $0x14] sm:$0xc] %vm521_vm2, %v573_v46  ;;  %v575_v60 = vrot.slane %v573_v46, 4  ;;  %v892_v46 = vsub.s32 0, %v2765_v3 }
  0x9b   : > { %v604_v61 = vrot.slane %v601_v47, 4 }
  0x9d   : > { %v543_v48 = vpop.permute.xlu1 %542 }
  0x9e   : > { %v509_v49 = vpop.permute.xlu0 %508  ;;  %v545_v52 = vrot.slane %v543_v48, 4  ;;  %552 = vst.msk [vmem:[#allocation2 + $0x14] sm:$0x3] %vm489_vm0, %v543_v48  ;;  %v888_v48 = vld [vmem:[%s3253_s1] sm:$0x7]  ;;  %s2637_s1 = smov 115  }
  0x9f   : > { %v512_v53 = vrot.slane %v509_v49, 4 }
  0xa0   : > { %v546_v54 = vsel %vm514_vm3, %v544_v50, %v545_v52 }
  0xa1   : > { %v515_v55 = vsel %vm514_vm3, %v512_v53, %v513_v51  ;;  %v548_v56 = vsel %vm547_vm4, %v541_v44, %v546_v54  ;;  %v603_v58 = vpop.permute.xlu1 %602  ;;  %v893_v53 = vrot.slane %v888_v48, %v892_v46 }
  0xa2   : > { %v517_v57 = vsel %vm516_vm5, %v509_v49, %v515_v55  ;;  %v571_v59 = vpop.permute.xlu0 %570  ;;  %551 = vst [vmem:[#allocation2 + $0xc] sm:$0x33] %v548_v56  ;;  %v605_v62 = vrot.slane %v603_v58, 4  ;;  %612 = vst.msk [vmem:[#allocation2 + $0x20] sm:$0x3] %vm489_vm0, %v603_v58  ;;  %v896_v49 = vsub.s32 1, %v2765_v3 }
  0xa3   : > { %520 = vst [vmem:[#allocation2] sm:$0xcc] %v517_v57  ;;  %v574_v63 = vrot.slane %v571_v59, 4 }
  0xa4   : > { %v606_v0 = vsel %vm514_vm3, %v604_v61, %v605_v62  ;;  %v897_v55 = vrot.slane %v888_v48, %v896_v49 }
  0xa5   : > { %v576_v1 = vsel %vm514_vm3, %v574_v63, %v575_v60  ;;  %v608_v2 = vsel %vm607_vm6, %v601_v47, %v606_v0  ;;  %v633_v5 = vpop.permute.xlu1 %632  ;;  %v2504_v40 = vld [vmem:[#allocation2 + $0x8] ss:$12 sps:$4 sm:$0xff]   ;;  %v900_v63 = vsub.s32 2, %v2765_v3 }
  0xa6   : > { %v578_v4 = vsel %vm577_vm7, %v571_v59, %v576_v1  ;;  %v631_v6 = vpop.permute.xlu0 %630  ;;  %611 = vst [vmem:[#allocation2 + $0x18] sm:$0x33] %v608_v2  ;;  %v635_v7 = vrot.slane %v633_v5, 4  ;;  %642 = vst.msk [vmem:[#allocation2 + $0x20] sm:$0xc] %vm521_vm2, %v633_v5 }
  0xa7   : > { %581 = vst [vmem:[#allocation2 + $0xc] sm:$0xcc] %v578_v4  ;;  %v634_v8 = vrot.slane %v631_v6, 4  ;;  %v901_v2 = vrot.slane %v888_v48, %v900_v63 }
  0xa9   : > { %v636_v9 = vsel %vm514_vm3, %v634_v8, %v635_v7  ;;  %v663_v11 = vpop.permute.xlu1 %662 }
  0xaa   : > { %v638_v10 = vsel %vm637_vm8, %v631_v6, %v636_v9  ;;  %v661_v12 = vpop.permute.xlu0 %660  ;;  %v665_v13 = vrot.slane %v663_v11, 4  ;;  %672 = vst.msk [vmem:[#allocation2 + $0x2c] sm:$0x3] %vm489_vm0, %v663_v11  ;;  %v734_v16 = vld [vmem:[#allocation2] sm:$0xff] }
  0xab   : > { %641 = vst [vmem:[#allocation2 + $0x18] sm:$0xcc] %v638_v10  ;;  %v664_v14 = vrot.slane %v661_v12, 4 }
  0xad   : > { %v666_v15 = vsel %vm514_vm3, %v664_v14, %v665_v13  ;;  %v693_v18 = vpop.permute.xlu1 %692 }
  0xae   : > { %v668_v17 = vsel %vm667_vm9, %v661_v12, %v666_v15  ;;  %v691_v19 = vpop.permute.xlu0 %690  ;;  %v736_v20 = vld [vmem:[#allocation2 + $0xc] sm:$0xff]  ;;  %v695_v22 = vrot.slane %v693_v18, 4  ;;  %702 = vst.msk [vmem:[#allocation2 + $0x2c] sm:$0xc] %vm521_vm2, %v693_v18  ;;  %vm924_vm2 = vcmask 154624  }
  0xaf   : > { %v2497_v21 = vld [vmem:[#allocation2 + $0x4] ss:$12 sps:$4 sm:$0xff]   ;;  %671 = vst [vmem:[#allocation2 + $0x24] sm:$0x33] %v668_v17  ;;  %v694_v23 = vrot.slane %v691_v19, 4  ;;  %v2205_v24 = vcombine.low %v734_v16, %v736_v20 }
  0xb0   : > { %804 = vmatprep.subr.bf16.mxu0 %v2497_v21 }
  0xb1   : > { %v696_v25 = vsel %vm514_vm3, %v694_v23, %v695_v22  ;;  %805 = vmatpush1.bf16.msra.mxu0 %v2205_v24  ;;  %v723_v27 = vpop.permute.xlu1 %722  ;;  %v1087_v22 = vld [vmem:[%s3211_s5] sm:$0xff] }
  0xb2   : > { %v698_v26 = vsel %vm697_vm10, %v691_v19, %v696_v25  ;;  %v721_v28 = vpop.permute.xlu0 %720  ;;  %v725_v29 = vrot.slane %v723_v27, 4  ;;  %732 = vst.msk [vmem:[#allocation2 + $0x38] sm:$0x3] %vm489_vm0, %v723_v27  ;;  %vm930_vm0 = vcmask 1047556  }
  0xb3   : > { %701 = vst [vmem:[#allocation2 + $0x24] sm:$0xcc] %v698_v26  ;;  %v724_v30 = vrot.slane %v721_v28, 4 }
  0xb5   : > { %v726_v31 = vsel %vm514_vm3, %v724_v30, %v725_v29  ;;  %v2505_v43 = vld [vmem:[#allocation2 + $0x20] ss:$12 sps:$4 sm:$0xff]  }
  0xb6   : > { %v728_v32 = vsel %vm727_vm11, %v721_v28, %v726_v31 }
  0xb7   : > { %731 = vst [vmem:[#allocation2 + $0x30] sm:$0x33] %v728_v32 }
  0xb9   : > { %v2506_v44 = vld [vmem:[#allocation2 + $0x38] ss:$0 sps:$4 sm:$0x33]  }
  0xba   : > { %v2499_v33 = vld [vmem:[#allocation2 + $0x1c] ss:$12 sps:$4 sm:$0xff]   ;;  %v2501_v34 = vld [vmem:[#allocation2 + $0x18] ss:$12 sps:$4 sm:$0xff]   ;;  %v802_v45 = vsel %vm794_vm12, %v2506_v44, 0 }
  0xbb   : > { %806 = vmatprep.subr.bf16.mxu0 %v2499_v33 }
  0xbc   : > { %807 = vmatpush1.bf16.msra.mxu0 %v2501_v34 }
  0xbe   : > { %v742_v35 = vld [vmem:[#allocation2 + $0x30] sm:$0x33] }
  0xbf   : > { %v2212_v36 = vcombine.high %v742_v35, %v742_v35  ;;  %v2211_v37 = vcombine.low %v742_v35, %v742_v35 }
  0xc1   : > { %2214 = vmatprep.subr.msk.bf16.mxu0 %vm794_vm12, %v2212_v36  ;;  %v796_v38 = vsel %vm794_vm12, %v2211_v37, 0  ;;  %vm931_vm12 = vmor %vm930_vm0, %vm929_vm15 }
  0xc2   : > { %809 = vmatpush1.bf16.msra.mxu0 %v796_v38 }
  0xc3   : > { %2333 = vmatprep.subr.bf16.mxu0 %v2624_v42  ;;  %v748_v47 = vpop.permute.xlu0 %747 }
  0xc5   : > { %2215 = vmatmul.mubr.msk.bf16.vlgmr.msra.gmra.mrb[0].mxu0 %vm3227_vm13, %v733_v39 }
  0xc6   : > { %2334 = vmatpush3.bf16.msra.mxu0 %v2504_v40  ;;  %2339 = vmatprep.mubr.msk.bf16.mxu0 %vm2625_vm1, %v2624_v42 }
  0xc7   : > { %2335 = vmatprep.subr.bf16.mxu0 %v2624_v42 }
  0xca   : > { %2336 = vmatpush3.bf16.msra.mxu0 %v2505_v43 }
  0xcb   : > { %2337 = vmatprep.subr.bf16.mxu0 %v2624_v42 }
  0xce   : > { %2338 = vmatpush3.bf16.msra.mxu0 %v802_v45 }
  0xd1   : > { %2340 = vmatmul.mubr.msk.bf16.vlgmr.msra.gmra.mrb[4].mxu0 %vm3227_vm13, %v733_v39  ;;  %vm938_vm13 = vcmask 551936  }
  0xd2   : > { %1211 = vmatprep.mubr.bf16.mxu0 %v2623_v41 }
 0x198   : > { %v838_v50 = vpop.f32.mrb[0].mxu0 }
 0x199   : > { %v839_v51 = vadd.f32 %v838_v50, %v748_v47  ;;  %v840_v52 = vpop.f32.mrb[1].mxu0 }
 0x19a   : > { %v841_v54 = vadd.f32 %v840_v52, %v748_v47  ;;  %v842_v56 = vpop.f32.mrb[2].mxu0 }
 0x19b   : > { %v885_v57 = vmax.f32 %v839_v51, 0.0  ;;  %v843_v58 = vpop.f32.mrb[3].mxu0 }
 0x19c   : > { %v886_v59 = vmax.f32 %v841_v54, 0.0 }
 0x19d   : > { %v905_v60 = vmul.f32 %v893_v53, %v885_v57 }
 0x19e   : > { %v906_v61 = vmul.f32 %v897_v55, %v886_v59 }
 0x1a0   : > { %v2281_v62 = vpack.c.bf16 %v906_v61, %v905_v60 }
 0x1a2   : > { %919 = vrot.lane.b32.xlu1 %v2281_v62, %s2626_s26 }
 0x1a4   : > { %v879_v0 = vpop.f32.mrb[4].mxu0 }
 0x1a5   : > { %v880_v1 = vadd.f32 %v879_v0, %v748_v47  ;;  %v2341_v4 = vpop.f32.mrb[5].mxu0 }
 0x1a6   : > { %v882_v5 = vpop.f32.mrb[6].mxu0 }
 0x1a7   : > { %v887_v6 = vmax.f32 %v880_v1, 0.0  ;;  %v2342_v7 = vpop.f32.mrb[7].mxu0 }
 0x1a9   : > { %v907_v8 = vmul.f32 %v901_v2, %v887_v6 }
 0x1ab   : > { %v2282_v9 = vpack.c.bf16 %v907_v8, %v907_v8 }
 0x1ad   : > { %921 = vrot.lane.b32.xlu1 %v2282_v9, %s2626_s26  ;;  %s3255_s26 = smov 92  }
 0x214   : > { %v920_v10 = vpop.permute.xlu1 %919 }
 0x215   : > { %v923_v3 = vrot.slane %v920_v10, 4 }
 0x217   : > { %v925_v11 = vsel %vm924_vm2, %v923_v3, %v920_v10 }
 0x218   : > { %932 = vst.msk [vmem:[#allocation6] sm:$0xff] %vm931_vm12, %v925_v11 }
 0x21f   : > { %v935_v12 = vld [vmem:[#allocation6] sm:$0xff]  ;;  %v922_v13 = vpop.permute.xlu1 %921 }
 0x220   : > { %v926_v14 = vsel %vm924_vm2, %v923_v3, %v922_v13  ;;  %944 = vrot.lane.b32.xlu0 %v935_v12, %s3230_s21 }
 0x221   : > { %934 = vst.msk [vmem:[#allocation6 + $0x8] sm:$0xf] %vm933_vm14, %v926_v14 }
 0x224   : > { %960 = vrot.lane.b32.xlu0 %v935_v12, %s3232_s20 }
 0x228   : > { %976 = vrot.lane.b32.xlu0 %v935_v12, %s3235_s25  ;;  %v941_v15 = vld [vmem:[#allocation6 + $0x8] sm:$0xf] }
 0x229   : > { %946 = vrot.lane.b32.xlu1 %v941_v15, %s3230_s21  ;;  %v936_v16 = vld [vmem:[#allocation6 + $0x8] sm:$0xf]  ;;  %s3257_s21 = smov 90  }
 0x22a   : > { %939 = vst.msk [vmem:[#allocation3 + $0x8] sm:$0xf] %vm938_vm13, %v936_v16  ;;  %v957_v17 = vld [vmem:[#allocation6 + $0x8] sm:$0xf] }
 0x22b   : > { %v973_v18 = vld [vmem:[#allocation6 + $0x8] sm:$0xf] }
 0x22c   : > { %992 = vrot.lane.b32.xlu0 %v935_v12, %s3254_s28  ;;  %v989_v19 = vld [vmem:[#allocation6 + $0x8] sm:$0xf] }
 0x22d   : > { %962 = vrot.lane.b32.xlu1 %v957_v17, %s3232_s20  ;;  %v1005_v20 = vld [vmem:[#allocation6 + $0x8] sm:$0xf]  ;;  %s3261_s20 = smov 126  }
 0x22e   : > { %v1021_v21 = vld [vmem:[#allocation6 + $0x8] sm:$0xf] }
 0x22f   : > { %v1037_v23 = vld [vmem:[#allocation6 + $0x8] sm:$0xf] }
 0x230   : > { %1008 = vrot.lane.b32.xlu0 %v935_v12, %s3234_s27  ;;  %v1053_v24 = vld [vmem:[#allocation6 + $0x8] sm:$0xf] }
 0x231   : > { %978 = vrot.lane.b32.xlu1 %v973_v18, %s3235_s25 }
 0x234   : > { %1024 = vrot.lane.b32.xlu0 %v935_v12, %s3255_s26 }
 0x235   : > { %994 = vrot.lane.b32.xlu1 %v989_v19, %s3254_s28  ;;  %s3262_s28 = smov 108  }
 0x238   : > { %1040 = vrot.lane.b32.xlu0 %v935_v12, %s3256_s18 }
 0x239   : > { %1010 = vrot.lane.b32.xlu1 %v1005_v20, %s3234_s27  ;;  %s3259_s27 = smov 127  }
 0x23c   : > { %1056 = vrot.lane.b32.xlu0 %v935_v12, %s3257_s21 }
 0x23d   : > { %1026 = vrot.lane.b32.xlu1 %v1021_v21, %s3255_s26  ;;  %s2631_s26 = smov 107  }
 0x240   : > { %1090 = vperm.xlu0 %2464, %v1087_v22  }
 0x241   : > { %1042 = vrot.lane.b32.xlu1 %v1037_v23, %s3256_s18  ;;  %s2628_s18 = smov 118  }
 0x245   : > { %1058 = vrot.lane.b32.xlu1 %v1053_v24, %s3257_s21  ;;  %s2627_s21 = smov 117  }
 0x292   : > { %v945_v25 = vpop.permute.xlu0 %944 }
 0x293   : > { %v948_v29 = vrot.slane %v945_v25, 4 }
 0x296   : > { %v961_v26 = vpop.permute.xlu0 %960 }
 0x297   : > { %v964_v35 = vrot.slane %v961_v26, 4 }
 0x29a   : > { %v977_v27 = vpop.permute.xlu0 %976 }
 0x29b   : > { %v947_v28 = vpop.permute.xlu1 %946  ;;  %v980_v46 = vrot.slane %v977_v27, 4 }
 0x29c   : > { %v949_v30 = vrot.slane %v947_v28, 4  ;;  %955 = vst.msk [vmem:[#allocation3 + $0x14] sm:$0xf] %vm938_vm13, %v947_v28 }
 0x29e   : > { %v950_v31 = vsel %vm514_vm3, %v948_v29, %v949_v30  ;;  %v993_v32 = vpop.permute.xlu0 %992 }
 0x29f   : > { %v951_v33 = vsel %vm516_vm5, %v945_v25, %v950_v31  ;;  %v963_v34 = vpop.permute.xlu1 %962  ;;  %v996_v51 = vrot.slane %v993_v32, 4  ;;  %v1068_v25 = vld [vmem:[%s3258_s4] sm:$0xf] }
 0x2a0   : > { %v965_v36 = vrot.slane %v963_v34, 4  ;;  %971 = vst.msk [vmem:[#allocation3 + $0x20] sm:$0xf] %vm938_vm13, %v963_v34  ;;  %v2219_v37 = vcombine.low %v935_v12, %v951_v33  ;;  %v2220_v38 = vcombine.high %v935_v12, %v951_v33 }
 0x2a2   : > { %v966_v39 = vsel %vm514_vm3, %v964_v35, %v965_v36  ;;  %1179 = vmatprep.subr.bf16.mxu0 %v2220_v38  ;;  %v1009_v43 = vpop.permute.xlu0 %1008 }
 0x2a3   : > { %v967_v40 = vsel %vm547_vm4, %v961_v26, %v966_v39  ;;  %v979_v44 = vpop.permute.xlu1 %978  ;;  %v2507_v45 = vld [vmem:[#allocation3 + $0x8] ss:$12 sps:$4 sm:$0xff]   ;;  %1180 = vmatpush1.bf16.msra.mxu0 %v2219_v37  ;;  %v1012_v60 = vrot.slane %v1009_v43, 4  ;;  %vm1165_vm4 = vcmask 588800  }
 0x2a4   : > { %v981_v47 = vrot.slane %v979_v44, 4  ;;  %987 = vst.msk [vmem:[#allocation3 + $0x2c] sm:$0xf] %vm938_vm13, %v979_v44  ;;  %2344 = vmatpush3.bf16.msra.mxu1 %v2507_v45  ;;  %v2514_v44 = vld [vmem:[%s3212_s6 + $0x48] sm:$0xff]  }
 0x2a5   : > { %2345 = vmatprep.subr.bf16.mxu1 %v2624_v42 }
 0x2a6   : > { %v982_v48 = vsel %vm514_vm3, %v980_v46, %v981_v47  ;;  %v1025_v55 = vpop.permute.xlu0 %1024 }
 0x2a7   : > { %v983_v49 = vsel %vm577_vm7, %v977_v27, %v982_v48  ;;  %v995_v50 = vpop.permute.xlu1 %994  ;;  %v1028_v2 = vrot.slane %v1025_v55, 4 }
 0x2a8   : > { %v997_v52 = vrot.slane %v995_v50, 4  ;;  %1003 = vst.msk [vmem:[#allocation3 + $0x38] sm:$0xf] %vm938_vm13, %v995_v50  ;;  %v2222_v53 = vcombine.low %v967_v40, %v983_v49  ;;  %v2223_v54 = vcombine.high %v967_v40, %v983_v49  ;;  %v2512_v40 = vld [vmem:[%s3212_s6 + $0x40] sm:$0xff]   ;;  %v2515_v50 = vld [vmem:[%s3212_s6 + $0x8] sm:$0xff]  }
 0x2a9   : > { %v2520_v49 = vld [vmem:[%s3212_s6 + $0x80] sm:$0xff]  }
 0x2aa   : > { %v998_v56 = vsel %vm514_vm3, %v996_v51, %v997_v52  ;;  %1181 = vmatprep.subr.bf16.mxu0 %v2223_v54  ;;  %v1041_v63 = vpop.permute.xlu0 %1040  ;;  %v2516_v52 = vld [vmem:[%s3212_s6 + $0x50] sm:$0xff]  }
 0x2ab   : > { %v999_v57 = vsel %vm607_vm6, %v993_v32, %v998_v56  ;;  %v1011_v58 = vpop.permute.xlu1 %1010  ;;  %v2508_v59 = vld [vmem:[#allocation3 + $0x20] ss:$12 sps:$4 sm:$0xff]   ;;  %1182 = vmatpush1.bf16.msra.mxu0 %v2222_v53  ;;  %v1044_v3 = vrot.slane %v1041_v63, 4  ;;  %v2517_v54 = vld [vmem:[%s3212_s6 + $0x10] sm:$0xff]   ;;  %vm1462_vm6 = vcmask 1040384  }
 0x2ac   : > { %v1013_v61 = vrot.slane %v1011_v58, 4  ;;  %1019 = vst.msk [vmem:[#allocation3 + $0x44] sm:$0xf] %vm938_vm13, %v1011_v58  ;;  %2346 = vmatpush3.bf16.msra.mxu1 %v2508_v59  ;;  %v2523_v53 = vld [vmem:[%s3212_s6 + $0x88] sm:$0xff]   ;;  %v2519_v56 = vld [vmem:[%s3212_s6 + $0x18] sm:$0xff]   ;;  %v2522_v58 = vld [vmem:[%s3212_s6 + $0x20] sm:$0xff]  }
 0x2ad   : > { %2347 = vmatprep.subr.bf16.mxu1 %v2624_v42  ;;  %v2524_v59 = vld [vmem:[%s3212_s6 + $0x68] sm:$0xff]  }
 0x2ae   : > { %v1014_v62 = vsel %vm514_vm3, %v1012_v60, %v1013_v61  ;;  %v1057_v12 = vpop.permute.xlu0 %1056  ;;  %v2525_v60 = vld [vmem:[%s3212_s6 + $0x28] sm:$0xff]   ;;  %v2526_v61 = vld [vmem:[%s3212_s6 + $0x90] sm:$0xff]  }
 0x2af   : > { %v1015_v0 = vsel %vm637_vm8, %v1009_v43, %v1014_v62  ;;  %v1027_v1 = vpop.permute.xlu1 %1026  ;;  %v1060_v16 = vrot.slane %v1057_v12, 4  ;;  %v2513_v43 = vld [vmem:[%s3212_s6] sm:$0xff]   ;;  %v2527_v62 = vld [vmem:[%s3212_s6 + $0x70] sm:$0xff]   ;;  %vm1552_vm8 = vcmask 814080  }
 0x2b0   : > { %v1029_v4 = vrot.slane %v1027_v1, 4  ;;  %1035 = vst.msk [vmem:[#allocation3 + $0x50] sm:$0xf] %vm938_vm13, %v1027_v1  ;;  %v2225_v5 = vcombine.low %v999_v57, %v1015_v0  ;;  %v2226_v6 = vcombine.high %v999_v57, %v1015_v0  ;;  %v2521_v57 = vld [vmem:[%s3212_s6 + $0x60] sm:$0xff]   ;;  %v1464_v1 = vsel %vm1462_vm6, 65535, %v2623_v41 }
 0x2b1   : > { %v2529_v0 = vld [vmem:[%s3212_s6 + $0x98] ss:$0 sps:$4 sm:$0x11]  }
 0x2b2   : > { %v1030_v7 = vsel %vm514_vm3, %v1028_v2, %v1029_v4  ;;  %1183 = vmatprep.subr.bf16.mxu0 %v2226_v6  ;;  %v1466_v2 = vand.u32 %v2529_v0, %v1464_v1  ;;  %v2530_v4 = vld [vmem:[%s3212_s6 + $0x78] sm:$0xff]   ;;  %v2537_v1 = vld [vmem:[%s3213_s7] sm:$0xff]  }
 0x2b3   : > { %v1031_v8 = vsel %vm667_vm9, %v1025_v55, %v1030_v7  ;;  %v1043_v9 = vpop.permute.xlu1 %1042  ;;  %v2509_v10 = vld [vmem:[#allocation3 + $0x38] ss:$12 sps:$4 sm:$0xff]   ;;  %1184 = vmatpush1.bf16.msra.mxu0 %v2225_v5  ;;  %v2518_v55 = vld [vmem:[%s3212_s6 + $0x58] sm:$0xff]   ;;  %vm1774_vm9 = vcmask 728064  }
 0x2b4   : > { %v1045_v11 = vrot.slane %v1043_v9, 4  ;;  %1051 = vst.msk [vmem:[#allocation3 + $0x5c] sm:$0xf] %vm938_vm13, %v1043_v9  ;;  %2348 = vmatpush3.bf16.msra.mxu1 %v2509_v10  ;;  %v2531_v5 = vld [vmem:[%s3212_s6 + $0x38] sm:$0xff]  }
 0x2b5   : > { %2349 = vmatprep.subr.bf16.mxu1 %v2624_v42 }
 0x2b6   : > { %v1046_v13 = vsel %vm514_vm3, %v1044_v3, %v1045_v11 }
 0x2b7   : > { %v1047_v14 = vsel %vm697_vm10, %v1041_v63, %v1046_v13  ;;  %v1059_v15 = vpop.permute.xlu1 %1058  ;;  %v2528_v63 = vld [vmem:[%s3212_s6 + $0x30] sm:$0xff]   ;;  %vm3263_vm10 = vcmask 293888  }
 0x2b8   : > { %v1061_v17 = vrot.slane %v1059_v15, 4  ;;  %1067 = vst.msk [vmem:[#allocation3 + $0x68] sm:$0xf] %vm938_vm13, %v1059_v15  ;;  %v2228_v18 = vcombine.low %v1031_v8, %v1047_v14  ;;  %v2229_v19 = vcombine.high %v1031_v8, %v1047_v14  ;;  %vm3264_vm13 = vmmov %vm3263_vm10 }
 0x2b9   : > { %vm3265_vm15 = vmmov %vm3263_vm10 }
 0x2ba   : > { %v1062_v20 = vsel %vm514_vm3, %v1060_v16, %v1061_v17  ;;  %1185 = vmatprep.subr.bf16.mxu0 %v2229_v19  ;;  %vm3266_vm0 = vmmov %vm3263_vm10 }
 0x2bb   : > { %v1063_v21 = vsel %vm727_vm11, %v1057_v12, %v1062_v20  ;;  %v2510_v22 = vld [vmem:[#allocation3 + $0x50] ss:$12 sps:$4 sm:$0xff]   ;;  %1186 = vmatpush1.bf16.msra.mxu0 %v2228_v18  ;;  %vm1933_vm11 = vcmask 130048   ;;  %vm3267_vm2 = vmmov %vm3266_vm0 }
 0x2bc   : > { %v2232_v23 = vcombine.high %v1063_v21, %v1063_v21  ;;  %v2231_v24 = vcombine.low %v1063_v21, %v1063_v21  ;;  %2350 = vmatpush3.bf16.msra.mxu1 %v2510_v22  ;;  %vm3268_vm12 = vmmov %vm3266_vm0 }
 0x2bd   : > { %2351 = vmatprep.subr.bf16.mxu1 %v2624_v42  ;;  %vm3269_vm14 = vmmov %vm3266_vm0 }
 0x2be   : > { %2234 = vmatprep.subr.msk.bf16.mxu0 %vm514_vm3, %v2232_v23  ;;  %v1171_v26 = vsel %vm514_vm3, %v2231_v24, 0  ;;  %vm3271_vm6 = vmmov %vm3266_vm0 }
 0x2bf   : > { %v2511_v27 = vld [vmem:[#allocation3 + $0x68] ss:$0 sps:$4 sm:$0xff]   ;;  %1188 = vmatpush1.bf16.msra.mxu0 %v1171_v26  ;;  %v1091_v29 = vpop.permute.xlu0 %1090 }
 0x2c0   : > { %v1177_v28 = vsel %vm514_vm3, %v2511_v27, 0  ;;  %2293 = vmatprep.subr.bf16.mxu0 %v2512_v40 }
 0x2c1   : > { %2352 = vmatpush3.bf16.msra.mxu1 %v1177_v28 }
 0x2c2   : > { %2235 = vmatmul.mubr.msk.bf16.vlgmr.msra.gmra.mrb[8].mxu0 %vm1165_vm4, %v1068_v25  ;;  %2357 = vmatprep.subr.bf16.mxu1 %v2624_v42 }
 0x2c3   : > { %2294 = vmatpush3.bf16.msra.mxu0 %v2513_v43 }
 0x2c4   : > { %2354 = vmatmul.mubr.msk.bf16.vlgmr.msra.gmra.mrb[0].mxu1 %vm1165_vm4, %v1068_v25  ;;  %2295 = vmatprep.subr.bf16.mxu0 %v2514_v44 }
 0x2c5   : > { %2365 = vmatprep.mubr.msk.bf16.mxu1 %vm2625_vm1, %v2624_v42  ;;  %2358 = vmatpush3.bf16.msra.mxu1 %v2520_v49  ;;  %v1614_v49 = vld [vmem:[%s3214_s8 + $0x8] sm:$0xff] }
 0x2c6   : > { %2359 = vmatprep.subr.bf16.mxu1 %v2624_v42 }
 0x2c7   : > { %2296 = vmatpush3.bf16.msra.mxu0 %v2515_v50  ;;  %v1613_v50 = vld [vmem:[%s3214_s8] sm:$0xff] }
 0x2c8   : > { %2297 = vmatprep.subr.bf16.mxu0 %v2516_v52 }
 0x2c9   : > { %2360 = vmatpush3.bf16.msra.mxu1 %v2523_v53 }
 0x2ca   : > { %2361 = vmatprep.subr.bf16.mxu1 %v2624_v42 }
 0x2cb   : > { %2298 = vmatpush3.bf16.msra.mxu0 %v2517_v54 }
 0x2cc   : > { %2299 = vmatprep.subr.bf16.mxu0 %v2518_v55 }
 0x2cd   : > { %2362 = vmatpush3.bf16.msra.mxu1 %v2526_v61 }
 0x2ce   : > { %2363 = vmatprep.subr.bf16.mxu1 %v2624_v42 }
 0x2cf   : > { %2300 = vmatpush3.bf16.msra.mxu0 %v2519_v56 }
 0x2d0   : > { %2301 = vmatprep.subr.bf16.mxu0 %v2521_v57 }
 0x2d1   : > { %2364 = vmatpush3.bf16.msra.mxu1 %v1466_v2 }
 0x2d2   : > { %2369 = vmatprep.subr.bf16.mxu1 %v2624_v42 }
 0x2d3   : > { %2302 = vmatpush3.bf16.msra.mxu0 %v2522_v58 }
 0x2d4   : > { %2303 = vmatprep.subr.bf16.mxu0 %v2524_v59 }
 0x2d7   : > { %2304 = vmatpush3.bf16.msra.mxu0 %v2525_v60 }
 0x2d8   : > { %2305 = vmatprep.subr.bf16.mxu0 %v2527_v62 }
 0x2db   : > { %2306 = vmatpush3.bf16.msra.mxu0 %v2528_v63 }
 0x2dc   : > { %2307 = vmatprep.subr.bf16.mxu0 %v2530_v4 }
 0x2df   : > { %2308 = vmatpush3.bf16.msra.mxu0 %v2531_v5 }
 0x2e0   : > { %2383 = vmatprep.subr.bf16.mxu0 %v2624_v42 }
 0x395   : > { %v1213_v30 = vpop.f32.mrb[8].mxu0 }
 0x396   : > { %v2932_v31 = vadd.f32 %v1213_v30, %v1091_v29  ;;  %v1215_v32 = vpop.f32.mrb[9].mxu0 }
 0x397   : > { %v2934_v33 = vadd.f32 %v1215_v32, %v1091_v29  ;;  %v1217_v34 = vpop.f32.mrb[10].mxu0  ;;  %v1254_v35 = vpop.f32.mrb[0].mxu1 }
 0x398   : > { %v1260_v36 = vmax.f32 %v2932_v31, 0.0  ;;  %v1218_v37 = vpop.f32.mrb[11].mxu0  ;;  %v1255_v38 = vadd.f32 %v1254_v35, %v1091_v29  ;;  %v2355_v39 = vpop.f32.mrb[1].mxu1 }
 0x399   : > { %v1257_v45 = vpop.f32.mrb[2].mxu1  ;;  %v1261_v47 = vmax.f32 %v2934_v33, 0.0 }
 0x39a   : > { %1266 = vrot.lane.b32.xlu0 %v1260_v36, %s3259_s27  ;;  %v1262_v46 = vmax.f32 %v1255_v38, 0.0  ;;  %v2356_v48 = vpop.f32.mrb[3].mxu1 }
 0x39c   : > { %v2465_v51 = vpack.i.bf16 %v1262_v46, %v1261_v47 }
 0x39e   : > { %2466 = vrot.lane.b32.xlu1 %v2465_v51, %s3259_s27 }
 0x40c   : > { %v1267_v9 = vpop.permute.xlu0 %1266 }
 0x410   : > { %v2467_v6 = vpop.permute.xlu1 %2466 }
 0x411   : > { %v2469_v7 = vunpack.i.h.bf16 %v2467_v6  ;;  %v2468_v8 = vunpack.i.l.bf16 %v2467_v6 }
 0x413   : > { %v1280_v10 = vmax.f32 %v1262_v46, %v2469_v7  ;;  %v1274_v3 = vsel %vm516_vm5, %v2468_v8, %v2469_v7  ;;  %v1273_v11 = vsel %vm516_vm5, %v1267_v9, %v2468_v8  ;;  %vm1458_vm5 = vcmask 400384   ;;  %v2538_v9 = vld [vmem:[%s3215_s9] sm:$0xff]  }
 0x414   : > { %v1278_v12 = vmax.f32 %v1260_v36, %v1273_v11  ;;  %v1279_v13 = vmax.f32 %v1261_v47, %v1274_v3  ;;  %v2539_v11 = vld [vmem:[%s3215_s9 + $0x8] sm:$0xff]  }
 0x416   : > { %1284 = vrot.lane.b32.xlu0 %v1278_v12, %s3260_s0  ;;  %v2470_v14 = vpack.i.bf16 %v1280_v10, %v1279_v13 }
 0x418   : > { %2471 = vrot.lane.b32.xlu1 %v2470_v14, %s3260_s0  ;;  %s458_s0 = sand.u32 1, %s2604_s30  }
 0x488   : > { %v1285_v18 = vpop.permute.xlu0 %1284 }
 0x48a   : > { %v2472_v15 = vpop.permute.xlu1 %2471 }
 0x48b   : > { %v2474_v16 = vunpack.i.h.bf16 %v2472_v15  ;;  %v2473_v17 = vunpack.i.l.bf16 %v2472_v15  ;;  %v2540_v15 = vld [vmem:[%s3215_s9 + $0x10] sm:$0xff]  }
 0x48d   : > { %v1298_v19 = vmax.f32 %v1280_v10, %v2474_v16  ;;  %v1291_v20 = vsel %vm577_vm7, %v1285_v18, %v2473_v17  ;;  %v1292_v21 = vsel %vm577_vm7, %v2473_v17, %v2474_v16  ;;  %vm1549_vm7 = vcmask 994304   ;;  %v2541_v16 = vld [vmem:[%s3215_s9 + $0x18] sm:$0xff]   ;;  %v2542_v17 = vld [vmem:[%s3215_s9 + $0x20] sm:$0xff]   ;;  %v2543_v18 = vld [vmem:[%s3215_s9 + $0x28] sm:$0x1f]  }
 0x48e   : > { %v1296_v22 = vmax.f32 %v1278_v12, %v1291_v20  ;;  %v1297_v23 = vmax.f32 %v1279_v13, %v1292_v21 }
 0x48f   : > { %v1301_v24 = vpack.c.bf16 %v1298_v19, %v1298_v19  ;;  %v2632_v19 = vmov 65535  }
 0x490   : > { %v1300_v25 = vpack.c.bf16 %v1297_v23, %v1297_v23  ;;  %v1299_v26 = vpack.c.bf16 %v1296_v22, %v1296_v22  ;;  %v1779_v20 = vsel %vm514_vm3, 4294967295, %v2632_v19 }
 0x491   : > { %2366 = vmatmul.mubr.msk.bf16.vlgmr.msra.gmra.mrb[4].mxu1 %vm1458_vm5, %v1301_v24  ;;  %vm2113_vm5 = vcmask 80896  }
 0x492   : > { %1500 = vmatprep.mubr.bf16.mxu0 %v1300_v25  ;;  %2379 = vmatprep.mubr.msk.bf16.mxu1 %vm2625_vm1, %v2624_v42 }
 0x493   : > { %1501 = vmatmul.mubr.bf16.vlgmr.msra.gmra.mrb[12].mxu0 %v1299_v26 }
 0x494   : > { %2395 = vmatprep.mubr.msk.bf16.mxu0 %vm2625_vm1, %v2624_v42  ;;  %2384 = vmatpush3.bf16.msra.mxu0 %v2538_v9  ;;  %vm1778_vm1 = vcmask 1044480  }
 0x495   : > { %2385 = vmatprep.subr.bf16.mxu0 %v2624_v42  ;;  %v1780_v21 = vsel %vm1778_vm1, %v1779_v20, 0 }
 0x496   : > { %v1782_v22 = vand.u32 %v2543_v18, %v1780_v21 }
 0x498   : > { %2386 = vmatpush3.bf16.msra.mxu0 %v2539_v11 }
 0x499   : > { %2387 = vmatprep.subr.bf16.mxu0 %v2624_v42 }
 0x49c   : > { %2388 = vmatpush3.bf16.msra.mxu0 %v2540_v15 }
 0x49d   : > { %2389 = vmatprep.subr.bf16.mxu0 %v2624_v42 }
 0x4a0   : > { %2390 = vmatpush3.bf16.msra.mxu0 %v2541_v16 }
 0x4a1   : > { %2391 = vmatprep.subr.bf16.mxu0 %v2624_v42 }
 0x4a4   : > { %2392 = vmatpush3.bf16.msra.mxu0 %v2542_v17 }
 0x4a5   : > { %2393 = vmatprep.subr.bf16.mxu0 %v2624_v42 }
 0x4a8   : > { %2394 = vmatpush3.bf16.msra.mxu0 %v1782_v22 }
 0x564   : > { %v1542_v27 = vpop.f32.mrb[4].mxu1 }
 0x565   : > { %v2367_v28 = vpop.f32.mrb[5].mxu1 }
 0x566   : > { %v2309_v29 = vpop.f32.mrb[12].mxu0  ;;  %v1545_v30 = vpop.f32.mrb[6].mxu1 }
 0x567   : > { %v2310_v31 = vpop.f32.mrb[13].mxu0  ;;  %v2368_v32 = vpop.f32.mrb[7].mxu1 }
 0x568   : > { %v2311_v33 = vadd.f32 %v2310_v31, %v2309_v29  ;;  %v2312_v34 = vpop.f32.mrb[14].mxu0 }
 0x569   : > { %v2313_v35 = vpop.f32.mrb[15].mxu0 }
 0x56a   : > { %v1543_v36 = vadd.f32 %v2311_v33, %v1542_v27 }
 0x56c   : > { %v1548_v37 = vpack.c.bf16 %v1543_v36, %v1543_v36 }
 0x56e   : > { %1550 = vst.msk [vmem:[#allocation7] sm:$0xf] %vm1549_vm7, %v1548_v37  ;;  %vm2129_vm7 = vcmask 73728  }
 0x575   : > { %v1551_v38 = vld [vmem:[#allocation7] sm:$0xf] }
 0x576   : > { %v1560_v39 = vld [vmem:[#allocation7] sm:$0xf]  ;;  %1553 = vst.msk [vmem:[#allocation4] sm:$0xf] %vm1552_vm8, %v1551_v38 }
 0x577   : > { %v1554_v40 = vld [vmem:[#allocation7] sm:$0xf]  ;;  %1562 = vrot.lane.b32.xlu0 %v1560_v39, %s3261_s20 }
 0x578   : > { %1556 = vrot.lane.b32.xlu1 %v1554_v40, %s3259_s27  ;;  %v1572_v43 = vld [vmem:[#allocation7] sm:$0xf] }
 0x579   : > { %v1566_v44 = vld [vmem:[#allocation7] sm:$0xf] }
 0x57a   : > { %v1584_v45 = vld [vmem:[#allocation7] sm:$0xf] }
 0x57b   : > { %1574 = vrot.lane.b32.xlu0 %v1572_v43, %s2627_s21  ;;  %v1578_v46 = vld [vmem:[#allocation7] sm:$0xf]  ;;  %v1892_v43 = vld [vmem:[%s3217_s11 + $0x8] sm:$0xff]  ;;  %s3272_s21 = smov 122  }
 0x57c   : > { %1568 = vrot.lane.b32.xlu1 %v1566_v44, %s2628_s18  ;;  %v1596_v47 = vld [vmem:[#allocation7] sm:$0xf] }
 0x57d   : > { %v1590_v48 = vld [vmem:[#allocation7] sm:$0xf] }
 0x57e   : > { %v1891_v44 = vld [vmem:[%s3217_s11] sm:$0xff] }
 0x57f   : > { %1586 = vrot.lane.b32.xlu0 %v1584_v45, %s3262_s28  ;;  %s3239_s28 = smov 122   ;;  %v1894_v45 = vld [vmem:[%s3217_s11 + $0x18] sm:$0xff] }
 0x580   : > { %1580 = vrot.lane.b32.xlu1 %v1578_v46, %s3237_s2  ;;  %v1893_v46 = vld [vmem:[%s3217_s11 + $0x10] sm:$0xff] }
 0x583   : > { %1598 = vrot.lane.b32.xlu0 %v1596_v47, %s2630_s3  ;;  %s2635_s3 = smov 120   ;;  %v2544_v47 = vld [vmem:[%s3216_s10 + $0x4] ss:$8 sps:$4 sm:$0xff]  }
 0x584   : > { %1592 = vrot.lane.b32.xlu1 %v1590_v48, %s2631_s26  ;;  %s3241_s26 = smov 114  }
 0x587   : > { %1622 = vperm.xlu0 %2464, %v1614_v49  }
 0x588   : > { %1617 = vperm.xlu1 %2475, %v1613_v50  }
 0x5e9   : > { %v1563_v51 = vpop.permute.xlu0 %1562 }
 0x5ea   : > { %v1557_v52 = vpop.permute.xlu1 %1556  ;;  %1565 = vst.msk [vmem:[#allocation4 + $0x8] sm:$0xf] %vm1552_vm8, %v1563_v51 }
 0x5eb   : > { %1559 = vst.msk [vmem:[#allocation4 + $0x4] sm:$0xf] %vm1552_vm8, %v1557_v52 }
 0x5ed   : > { %v1575_v53 = vpop.permute.xlu0 %1574 }
 0x5ee   : > { %v1569_v54 = vpop.permute.xlu1 %1568  ;;  %1577 = vst.msk [vmem:[#allocation4 + $0x10] sm:$0xf] %vm1552_vm8, %v1575_v53 }
 0x5ef   : > { %1571 = vst.msk [vmem:[#allocation4 + $0xc] sm:$0xf] %vm1552_vm8, %v1569_v54 }
 0x5f1   : > { %v1587_v55 = vpop.permute.xlu0 %1586 }
 0x5f2   : > { %v1581_v56 = vpop.permute.xlu1 %1580  ;;  %v2532_v57 = vld [vmem:[#allocation4] sm:$0xff]   ;;  %1589 = vst.msk [vmem:[#allocation4 + $0x18] sm:$0xf] %vm1552_vm8, %v1587_v55 }
 0x5f3   : > { %1583 = vst.msk [vmem:[#allocation4 + $0x14] sm:$0xf] %vm1552_vm8, %v1581_v56  ;;  %2370 = vmatpush3.bf16.msra.mxu1 %v2532_v57 }
 0x5f4   : > { %2371 = vmatprep.subr.bf16.mxu1 %v2624_v42 }
 0x5f5   : > { %v1599_v58 = vpop.permute.xlu0 %1598 }
 0x5f6   : > { %v1593_v59 = vpop.permute.xlu1 %1592  ;;  %v2533_v60 = vld [vmem:[#allocation4 + $0x8] sm:$0xff]   ;;  %1601 = vst.msk [vmem:[#allocation4 + $0x20] sm:$0xf] %vm1552_vm8, %v1599_v58 }
 0x5f7   : > { %1595 = vst.msk [vmem:[#allocation4 + $0x1c] sm:$0xf] %vm1552_vm8, %v1593_v59  ;;  %2372 = vmatpush3.bf16.msra.mxu1 %v2533_v60 }
 0x5f8   : > { %2373 = vmatprep.subr.bf16.mxu1 %v2624_v42 }
 0x5fa   : > { %v2534_v61 = vld [vmem:[#allocation4 + $0x10] sm:$0xff]  }
 0x5fb   : > { %2374 = vmatpush3.bf16.msra.mxu1 %v2534_v61 }
 0x5fc   : > { %2375 = vmatprep.subr.bf16.mxu1 %v2624_v42 }
 0x5fd   : > { %v2536_v63 = vld [vmem:[#allocation4 + $0x20] ss:$0 sps:$4 sm:$0xff]  }
 0x5fe   : > { %v2535_v62 = vld [vmem:[#allocation4 + $0x18] sm:$0xff]   ;;  %v1661_v0 = vsel %vm514_vm3, %v2536_v63, 0  ;;  %vm1826_vm3 = vcmask 408576  }
 0x5ff   : > { %2376 = vmatpush3.bf16.msra.mxu1 %v2535_v62 }
 0x600   : > { %2377 = vmatprep.subr.bf16.mxu1 %v2624_v42 }
 0x603   : > { %2378 = vmatpush3.bf16.msra.mxu1 %v1661_v0  ;;  %v2546_v0 = vld [vmem:[%s3216_s10] ss:$8 sps:$4 sm:$0xff]  }
 0x604   : > { %1940 = vmatprep.subr.bf16.mxu1 %v2623_v41 }
 0x606   : > { %2380 = vmatmul.mubr.msk.bf16.vlgmr.msra.gmra.mrb[8].mxu1 %vm1165_vm4, %v2537_v1  ;;  %v1623_v7 = vpop.permute.xlu0 %1622  ;;  %vm3270_vm4 = vmmov %vm3266_vm0  ;;  %v2547_v1 = vld [vmem:[%s3216_s10 + $0x14] ss:$8 sps:$4 sm:$0xff]  }
 0x607   : > { %v1618_v2 = vpop.permute.xlu1 %1617  ;;  %2276 = vmatprep.mubr.msk.bf16.mxu1 %vm1933_vm11, %v2544_v47 }
 0x6d9   : > { %v1697_v4 = vpop.f32.mrb[8].mxu1 }
 0x6da   : > { %v1698_v5 = vadd.f32 %v1697_v4, %v1618_v2  ;;  %v2381_v6 = vpop.f32.mrb[9].mxu1  ;;  %v2549_v2 = vld [vmem:[%s3216_s10 + $0x10] ss:$8 sps:$4 sm:$0xff]  }
 0x6db   : > { %v1700_v8 = vpop.f32.mrb[10].mxu1 }
 0x6dc   : > { %v1701_v10 = vadd.f32 %v1700_v8, %v1623_v7  ;;  %v2382_v3 = vpop.f32.mrb[11].mxu1  ;;  %v1704_v12 = vmax.f32 %v1698_v5, 0.0 }
 0x6de   : > { %v1705_v13 = vmax.f32 %v1701_v10, 0.0 }
 0x6e0   : > { %v2476_v14 = vpack.i.bf16 %v1705_v13, %v1704_v12 }
 0x6e2   : > { %2477 = vrot.lane.b32.xlu1 %v2476_v14, %s3259_s27 }
 0x754   : > { %v2478_v23 = vpop.permute.xlu1 %2477 }
 0x755   : > { %v2480_v24 = vunpack.i.h.bf16 %v2478_v23  ;;  %v2479_v25 = vunpack.i.l.bf16 %v2478_v23 }
 0x757   : > { %v1715_v26 = vmax.f32 %v1705_v13, %v2480_v24  ;;  %v1714_v27 = vmax.f32 %v1704_v12, %v2479_v25 }
 0x759   : > { %v2481_v28 = vpack.i.bf16 %v1715_v26, %v1714_v27 }
 0x75b   : > { %2482 = vrot.lane.b32.xlu0 %v2481_v28, %s2628_s18  ;;  %s2633_s18 = smov 121  }
 0x7cd   : > { %v2483_v42 = vpop.permute.xlu0 %2482 }
 0x7ce   : > { %v2485_v29 = vunpack.i.h.bf16 %v2483_v42  ;;  %v2484_v30 = vunpack.i.l.bf16 %v2483_v42 }
 0x7d0   : > { %v1725_v31 = vmax.f32 %v1715_v26, %v2485_v29  ;;  %v1724_v32 = vmax.f32 %v1714_v27, %v2484_v30  ;;  %v2638_v29 = vmov 7  }
 0x7d2   : > { %v1726_v33 = vpack.c.bf16 %v1725_v31, %v1724_v32 }
 0x7d4   : > { %2396 = vmatmul.mubr.msk.bf16.vlgmr.msra.gmra.mrb[16].mxu0 %vm1774_vm9, %v1726_v33 }
 0x8a7   : > { %v1818_v34 = vpop.f32.mrb[16].mxu0 }
 0x8a8   : > { %v2397_v35 = vpop.f32.mrb[17].mxu0 }
 0x8a9   : > { %v1821_v36 = vpop.f32.mrb[18].mxu0 }
 0x8aa   : > { %v1825_v37 = vpack.c.bf16 %v1821_v36, %v1818_v34  ;;  %v2398_v38 = vpop.f32.mrb[19].mxu0 }
 0x8ac   : > { %1827 = vst.msk [vmem:[#allocation8] sm:$0xff] %vm1826_vm3, %v1825_v37 }
 0x8b3   : > { %v1828_v39 = vld [vmem:[#allocation8] sm:$0xff] }
 0x8b4   : > { %1829 = vst.msk [vmem:[#allocation5] sm:$0xff] %vm3263_vm10, %v1828_v39  ;;  %1838 = vrot.lane.b32.xlu0 %v1828_v39, %s3261_s20  ;;  %1832 = vrot.lane.b32.xlu1 %v1828_v39, %s3259_s27 }
 0x8b8   : > { %1850 = vrot.lane.b32.xlu0 %v1828_v39, %s2633_s18  ;;  %1844 = vrot.lane.b32.xlu1 %v1828_v39, %s3239_s28  ;;  %s3274_s18 = smov 114   ;;  %s2132_s28 = scalar_lea.sflag [#allocation10], %s458_s0 }
 0x8bb   : > { %v1882_v40 = vld [vmem:[#allocation5] sm:$0xff] }
 0x8bc   : > { %1862 = vrot.lane.b32.xlu0 %v1828_v39, %s3237_s2  ;;  %1856 = vrot.lane.b32.xlu1 %v1828_v39, %s2635_s3 }
 0x8bd   : > { %1941 = vmatpush1.bf16.msra.mxu1 %v1882_v40 }
 0x8be   : > { %1942 = vmatprep.subr.bf16.mxu1 %v2623_v41 }
 0x8c0   : > { %1874 = vrot.lane.b32.xlu0 %v1828_v39, %s3241_s26  ;;  %1868 = vrot.lane.b32.xlu1 %v1828_v39, %s2637_s1 }
 0x8c4   : > { %1902 = vperm.xlu0 %2464, %v1892_v43   ;;  %1897 = vperm.xlu1 %2475, %v1891_v44  }
 0x8c8   : > { %1912 = vperm.xlu0 %2464, %v1894_v45   ;;  %1907 = vperm.xlu1 %2475, %v1893_v46  }
 0x8cc   : > { %2486 = vset.pattern.permute.xlu1 %v2638_v29  ;;  %2487 = vset.pattern.permute.xlu0 %v2638_v29 }
 0x926   : > { %v1839_v48 = vpop.permute.xlu0 %1838  ;;  %v1833_v49 = vpop.permute.xlu1 %1832 }
 0x927   : > { %1841 = vst.msk [vmem:[#allocation5 + $0x10] sm:$0xff] %vm3264_vm13, %v1839_v48 }
 0x928   : > { %1835 = vst.msk [vmem:[#allocation5 + $0x8] sm:$0xff] %vm3265_vm15, %v1833_v49 }
 0x92a   : > { %v1851_v50 = vpop.permute.xlu0 %1850  ;;  %v1845_v51 = vpop.permute.xlu1 %1844 }
 0x92b   : > { %1853 = vst.msk [vmem:[#allocation5 + $0x20] sm:$0xff] %vm3266_vm0, %v1851_v50 }
 0x92c   : > { %1847 = vst.msk [vmem:[#allocation5 + $0x18] sm:$0xff] %vm3267_vm2, %v1845_v51 }
 0x92e   : > { %v1863_v52 = vpop.permute.xlu0 %1862  ;;  %v1857_v53 = vpop.permute.xlu1 %1856  ;;  %v1884_v57 = vld [vmem:[#allocation5 + $0x10] sm:$0xff] }
 0x92f   : > { %v1883_v54 = vld [vmem:[#allocation5 + $0x8] sm:$0xff]  ;;  %1865 = vst.msk [vmem:[#allocation5 + $0x30] sm:$0xff] %vm3268_vm12, %v1863_v52 }
 0x930   : > { %1859 = vst.msk [vmem:[#allocation5 + $0x28] sm:$0xff] %vm3269_vm14, %v1857_v53  ;;  %1943 = vmatpush1.bf16.msra.mxu1 %v1883_v54 }
 0x931   : > { %1944 = vmatprep.subr.bf16.mxu1 %v2623_v41 }
 0x932   : > { %v1875_v55 = vpop.permute.xlu0 %1874  ;;  %v1869_v56 = vpop.permute.xlu1 %1868  ;;  %v1886_v59 = vld [vmem:[#allocation5 + $0x20] sm:$0xff] }
 0x933   : > { %1877 = vst.msk [vmem:[#allocation5 + $0x40] sm:$0xff] %vm3270_vm4, %v1875_v55  ;;  %v1885_v58 = vld [vmem:[#allocation5 + $0x18] sm:$0xff] }
 0x934   : > { %1871 = vst.msk [vmem:[#allocation5 + $0x38] sm:$0xff] %vm3271_vm6, %v1869_v56  ;;  %1945 = vmatpush1.bf16.msra.mxu1 %v1884_v57 }
 0x935   : > { %1946 = vmatprep.subr.bf16.mxu1 %v2623_v41 }
 0x936   : > { %v1888_v61 = vld [vmem:[#allocation5 + $0x30] sm:$0xff] }
 0x937   : > { %v1887_v60 = vld [vmem:[#allocation5 + $0x28] sm:$0xff] }
 0x938   : > { %1947 = vmatpush1.bf16.msra.mxu1 %v1885_v58 }
 0x939   : > { %1948 = vmatprep.subr.bf16.mxu1 %v2623_v41 }
 0x93a   : > { %v1890_v63 = vld [vmem:[#allocation5 + $0x40] sm:$0xff] }
 0x93b   : > { %v1889_v62 = vld [vmem:[#allocation5 + $0x38] sm:$0xff] }
 0x93c   : > { %1949 = vmatpush1.bf16.msra.mxu1 %v1886_v59 }
 0x93d   : > { %1950 = vmatprep.subr.bf16.mxu1 %v2623_v41 }
 0x940   : > { %1951 = vmatpush1.bf16.msra.mxu1 %v1887_v60 }
 0x941   : > { %1952 = vmatprep.subr.bf16.mxu1 %v2623_v41 }
 0x943   : > { %v1898_v4 = vpop.permute.xlu1 %1897  ;;  %v1903_v7 = vpop.permute.xlu0 %1902 }
 0x944   : > { %1953 = vmatpush1.bf16.msra.mxu1 %v1888_v61 }
 0x945   : > { %1954 = vmatprep.subr.bf16.mxu1 %v2623_v41 }
 0x947   : > { %v1908_v12 = vpop.permute.xlu1 %1907  ;;  %v1913_v16 = vpop.permute.xlu0 %1912 }
 0x948   : > { %1955 = vmatpush1.bf16.msra.mxu1 %v1889_v62 }
 0x949   : > { %1956 = vmatprep.subr.bf16.mxu1 %v2623_v41 }
 0x94c   : > { %1957 = vmatpush1.bf16.msra.mxu1 %v1890_v63 }
 0x94f   : > { %1973 = vmatmul.mubr.bf16.vlgmr.msra.gmra.mrb[12].mxu1 %v2546_v0  ;;  %v2086_v0 = vld [vmem:[%s3218_s12 + $0x8] sm:$0xff] }
 0x950   : > { %2277 = vmatprep.mubr.msk.bf16.mxu1 %vm1933_vm11, %v2547_v1 }
 0x957   : > { %1981 = vmatmul.mubr.bf16.gmra.mrb[16].mxu1 %v2549_v2  ;;  %v2085_v2 = vld [vmem:[%s3218_s12] sm:$0xff] }
 0xa22   : > { %v1974_v41 = vpop.f32.mrb[12].mxu1 }
 0xa23   : > { %v1975_v5 = vadd.f32 %v1974_v41, %v1898_v4  ;;  %v1976_v6 = vpop.f32.mrb[13].mxu1 }
 0xa24   : > { %v1977_v8 = vpop.f32.mrb[14].mxu1 }
 0xa25   : > { %v1989_v9 = vmax.f32 %v1975_v5, 0.0  ;;  %v1978_v10 = vadd.f32 %v1977_v8, %v1903_v7  ;;  %v1979_v3 = vpop.f32.mrb[15].mxu1  ;;  %v2087_v5 = vld [vmem:[%s3218_s12 + $0x10] sm:$0xff] }
 0xa27   : > { %v1990_v11 = vmax.f32 %v1978_v10, 0.0  ;;  %1997 = vrot.lane.b32.xlu1 %v1989_v9, %s3259_s27  ;;  %v2088_v10 = vld [vmem:[%s3218_s12 + $0x18] sm:$0xff] }
 0xa29   : > { %1999 = vrot.lane.b32.xlu0 %v1990_v11, %s3259_s27 }
 0xa2a   : > { %v1982_v13 = vpop.f32.mrb[16].mxu1 }
 0xa2b   : > { %v1983_v14 = vadd.f32 %v1982_v13, %v1908_v12  ;;  %v1984_v15 = vpop.f32.mrb[17].mxu1 }
 0xa2c   : > { %v1985_v17 = vpop.f32.mrb[18].mxu1 }
 0xa2d   : > { %v1991_v18 = vmax.f32 %v1983_v14, 0.0  ;;  %v1986_v19 = vadd.f32 %v1985_v17, %v1913_v16  ;;  %v1987_v20 = vpop.f32.mrb[19].mxu1 }
 0xa2f   : > { %v1992_v21 = vmax.f32 %v1986_v19, 0.0  ;;  %2001 = vrot.lane.b32.xlu1 %v1991_v18, %s3259_s27 }
 0xa31   : > { %2003 = vrot.lane.b32.xlu0 %v1992_v21, %s3259_s27  ;;  %s3273_s27 = smov 116  }
 0xa99   : > { %v1998_v22 = vpop.permute.xlu1 %1997 }
 0xa9a   : > { %v2009_v23 = vmax.f32 %v1989_v9, %v1998_v22 }
 0xa9b   : > { %v2000_v24 = vpop.permute.xlu0 %1999 }
 0xa9c   : > { %v2010_v25 = vmax.f32 %v1990_v11, %v2000_v24  ;;  %2017 = vrot.lane.b32.xlu1 %v2009_v23, %s3272_s21 }
 0xa9e   : > { %2019 = vrot.lane.b32.xlu0 %v2010_v25, %s3272_s21 }
 0xaa1   : > { %v2002_v26 = vpop.permute.xlu1 %2001 }
 0xaa2   : > { %v2011_v27 = vmax.f32 %v1991_v18, %v2002_v26 }
 0xaa3   : > { %v2004_v28 = vpop.permute.xlu0 %2003 }
 0xaa4   : > { %v2012_v42 = vmax.f32 %v1992_v21, %v2004_v28  ;;  %2021 = vrot.lane.b32.xlu1 %v2011_v27, %s3272_s21 }
 0xaa6   : > { %2023 = vrot.lane.b32.xlu0 %v2012_v42, %s3272_s21 }
 0xb0e   : > { %v2018_v30 = vpop.permute.xlu1 %2017 }
 0xb0f   : > { %v2029_v31 = vmax.f32 %v2009_v23, %v2018_v30  ;;  %v2127_v23 = vld [vmem:[%s3219_s13] sm:$0x1] }
 0xb10   : > { %v2020_v32 = vpop.permute.xlu0 %2019 }
 0xb11   : > { %2053 = vrot.lane.b32.xlu0 %v2029_v31, %s3273_s27  ;;  %2037 = vrot.lane.b32.xlu1 %v2029_v31, %s3261_s20  ;;  %v2030_v33 = vmax.f32 %v2010_v25, %v2020_v32 }
 0xb15   : > { %2069 = vrot.lane.b32.xlu0 %v2029_v31, %s3274_s18  ;;  %2055 = vrot.lane.b32.xlu1 %v2030_v33, %s3273_s27 }
 0xb16   : > { %v2022_v34 = vpop.permute.xlu1 %2021 }
 0xb17   : > { %v2031_v36 = vmax.f32 %v2011_v27, %v2022_v34 }
 0xb18   : > { %v2024_v35 = vpop.permute.xlu0 %2023 }
 0xb19   : > { %2039 = vrot.lane.b32.xlu0 %v2030_v33, %s3261_s20  ;;  %2071 = vrot.lane.b32.xlu1 %v2030_v33, %s3274_s18  ;;  %v2032_v37 = vmax.f32 %v2012_v42, %v2024_v35 }
 0xb1d   : > { %2043 = vrot.lane.b32.xlu0 %v2032_v37, %s3261_s20  ;;  %2041 = vrot.lane.b32.xlu1 %v2031_v36, %s3261_s20  ;;  %s459_s20 = scalar_lea.vmem [#allocation9], %s458_s0 }
 0xb1e   : > { %s2144_s3 = sshll.u32 %s459_s20, 4  ;;  %s3166_s3 = int_to_ptr.vmem [resolvable:$true] %s2144_s3 }
 0xb1f   : > { %s2550_s26 = scalar_lea.vmem %s3166_s3, 16 }
 0xb20   : > { %p2551_p11 = scmp.ne.s32.totalorder %s3166_s3, %s2550_s26 }
 0xb21   : > { %2059 = vrot.lane.b32.xlu0 %v2032_v37, %s3273_s27  ;;  %2057 = vrot.lane.b32.xlu1 %v2031_v36, %s3273_s27 }
 0xb22   : > { %p2552_p12 = pnand %p2551_p11, %p2753_p5 }
 0xb24   : > { %p2553_p13 = pneg %p2552_p12 }
 0xb25   : > { %2075 = vrot.lane.b32.xlu0 %v2032_v37, %s3274_s18  ;;  %2073 = vrot.lane.b32.xlu1 %v2031_v36, %s3274_s18  ;;  %s2278_s18 = sshll.u32 %s2736_s17, 4  ;;  %s2639_s17 = smov [#allocation9]  }
 0xb26   : > { %s3164_s2 = scalar_lea.hbm %s3220_s14, %s2278_s18  ;;  %s2554_s25 = sshll.u32 %s2639_s17, 4  ;;  %s2555_s25 = int_to_ptr.vmem [resolvable:$false] %s2554_s25 }
 0xb27   : > { %s2556_s21 = scalar_lea.vmem %s2555_s25, 32  ;;  %p2557_p0 = scmp.lt.s32.totalorder %s3166_s3, %s2555_s25 }
 0xb28   : > { %p2558_p1 = scmp.lt.s32.totalorder %s2556_s21, %s2550_s26 }
 0xb2a   : > { %p2559_p2 = por %p2558_p1, %p2557_p0 }
 0xb2c   : > { %p2560_p3 = pnand %p2559_p2, %p2553_p13 }
 0xb83   : > { %v2054_v38 = vpop.permute.xlu0 %2053  ;;  %v2038_v39 = vpop.permute.xlu1 %2037 }
 0xb84   : > { %v2049_v40 = vadd.f32 %v2038_v39, %v2029_v31 }
 0xb86   : > { %v2065_v43 = vadd.f32 %v2054_v38, %v2049_v40 }
 0xb87   : > { %v2070_v44 = vpop.permute.xlu0 %2069  ;;  %v2056_v45 = vpop.permute.xlu1 %2055 }
 0xb88   : > { %v2081_v46 = vadd.f32 %v2070_v44, %v2065_v43 }
 0xb8a   : > { %2091 = vperm.xlu1 %2486, %v2081_v46  }
 0xb8b   : > { %v2040_v47 = vpop.permute.xlu0 %2039  ;;  %v2072_v48 = vpop.permute.xlu1 %2071 }
 0xb8c   : > { %v2050_v49 = vadd.f32 %v2040_v47, %v2030_v33 }
 0xb8e   : > { %v2066_v50 = vadd.f32 %v2056_v45, %v2050_v49 }
 0xb8f   : > { %v2044_v51 = vpop.permute.xlu0 %2043  ;;  %v2042_v52 = vpop.permute.xlu1 %2041 }
 0xb90   : > { %v2082_v53 = vadd.f32 %v2072_v48, %v2066_v50  ;;  %v2051_v56 = vadd.f32 %v2042_v52, %v2031_v36  ;;  %v2052_v59 = vadd.f32 %v2044_v51, %v2032_v37 }
 0xb92   : > { %2096 = vperm.xlu0 %2487, %v2082_v53  }
 0xb93   : > { %v2060_v54 = vpop.permute.xlu0 %2059  ;;  %v2058_v55 = vpop.permute.xlu1 %2057 }
 0xb94   : > { %v2067_v57 = vadd.f32 %v2058_v55, %v2051_v56  ;;  %v2068_v62 = vadd.f32 %v2060_v54, %v2052_v59 }
 0xb97   : > { %v2074_v58 = vpop.permute.xlu1 %2073  ;;  %v2076_v61 = vpop.permute.xlu0 %2075 }
 0xb98   : > { %v2083_v60 = vadd.f32 %v2074_v58, %v2067_v57  ;;  %v2084_v63 = vadd.f32 %v2076_v61, %v2068_v62 }
 0xb9a   : > { %2101 = vperm.xlu1 %2486, %v2083_v60  }
 0xb9e   : > { %2106 = vperm.xlu1 %2486, %v2084_v63  }
 0xc09   : > { %v2092_v4 = vpop.permute.xlu1 %2091 }
 0xc0a   : > { %v2109_v6 = vmul.f32 %v2092_v4, %v2085_v2 }
 0xc0c   : > { %v2114_v3 = vsel %vm2113_vm5, %v2109_v6, 0.0 }
 0xc11   : > { %v2097_v1 = vpop.permute.xlu0 %2096 }
 0xc12   : > { %v2110_v41 = vmul.f32 %v2097_v1, %v2086_v0 }
 0xc14   : > { %v2115_v8 = vsel %vm2113_vm5, %v2110_v41, 0.0 }
 0xc15   : > { %v2116_v12 = vadd.f32 %v2115_v8, %v2114_v3 }
 0xc19   : > { %v2102_v7 = vpop.permute.xlu1 %2101 }
 0xc1a   : > { %v2111_v9 = vmul.f32 %v2102_v7, %v2087_v5 }
 0xc1c   : > { %v2117_v11 = vsel %vm2113_vm5, %v2111_v9, 0.0 }
 0xc1d   : > { %v2107_v13 = vpop.permute.xlu1 %2106  ;;  %v2118_v15 = vadd.f32 %v2117_v11, %v2116_v12 }
 0xc1e   : > { %v2112_v14 = vmul.f32 %v2107_v13, %v2088_v10 }
 0xc20   : > { %v2119_v16 = vsel %vm2113_vm5, %v2112_v14, 0.0 }
 0xc21   : > { %v2120_v17 = vadd.f32 %v2119_v16, %v2118_v15 }
 0xc23   : > { %v2121_v18 = vrot.slane %v2120_v17, 4 }
 0xc25   : > { %v2122_v19 = vadd.f32 %v2121_v18, %v2120_v17 }
 0xc27   : > { %v2123_v20 = vrot.slane %v2122_v19, 2 }
 0xc29   : > { %v2124_v21 = vadd.f32 %v2123_v20, %v2122_v19 }
 0xc2b   : > { %v2125_v22 = vrot.slane %v2124_v21, 1 }
 0xc2d   : > { %v2126_v24 = vadd.f32 %v2125_v22, %v2124_v21 }
 0xc2f   : > { %v2128_v25 = vadd.f32 %v2127_v23, %v2126_v24 }
 0xc31   : > { %2130 = vst.msk [vmem:[%s459_s20] sm:$0x1] %vm2129_vm7, %v2128_v25 }
 0xc32   : > { %2563 = shalt.err (!%p2560_p3)
}
 0xc33   : > { %s2564_s0 = scalar_lea.hbm %s3164_s2, 16  ;;  %s2568_s20 = scalar_lea.hbm %s3220_s14, 32 }
 0xc34   : > { %p2565_p4 = scmp.ne.s32.totalorder %s3164_s2, %s2564_s0  ;;  %p2569_p9 = scmp.lt.u32.totalorder %s3164_s2, %s3220_s14 }
 0xc35   : > { %p2570_p10 = scmp.lt.u32.totalorder %s2568_s20, %s2564_s0  ;;  %p2572_p12 = scmp.lt.u32.totalorder %s2564_s0, %s3164_s2 }
 0xc36   : > { %p2566_p7 = pnand %p2565_p4, %p2753_p5 }
 0xc37   : > { %p2571_p11 = por %p2570_p10, %p2569_p9 }
 0xc38   : > { %p2567_p8 = pneg %p2566_p7 }
 0xc39   : > { %p2573_p13 = por %p2572_p12, %p2571_p11 }
 0xc3b   : > { %p2574_p0 = pnand %p2573_p13, %p2567_p8 }
 0xc3d   : > { %2577 = shalt.err (!%p2574_p0)
}
 0xc3e   : > { %2400 = dma.vmem_to_hbm [thread:$0]  (%p2753_p5), %s3166_s3, 16, %s3164_s2, %s2132_s28  }
 0xc3f PF: > { %p2406_p1 = scmp.ge.s32.totalorder %s2612_s16, 2  ;;  %s2156_s26 = sand.u32 1, %s2600_s29  }
 0xc40   : > { %s2157_s17 = scalar_lea.sflag [#allocation10], %s2156_s26 }
 0xc41   : > { %p2403_p2 = pnand %p2406_p1, %p2757_p6 }
 0xc43   : > { %2595 = dma.done.wait (!%p2403_p2), %s2157_s17, 16  }
 0xc44   : > { %2597 = vsyncadd (!%p2403_p2), %s2157_s17, 4294967280  ;;  %p24_p3 = scmp.ge.s32.totalorder %s2740_s19, 4   ;;  %s3275_s29 = smov %s2604_s30 }
 0xc45   : > { %s3276_s30 = smov %s2608_s15  ;;  %s3277_s15 = smov %s2751_s22 }
 0xc46   : > { %s3278_s16 = smov %s2740_s19  ;;  %26 = sbr.rel (!%p24_p3) target bundleno = 9 (0x9), region = 111 }
 0xc4d   :  { %2161 = vsyncpa [#allocation10], 1 }
 0xc4e   :  { %2163 = vsyncpa [#allocation10 + $0x1], 1 }

</bundles_post_ra>
